<compile_context>
chip_gen: v7x
topology: tpu7x:2x2x1
jax: 0.10.0
libtpu: 0.0.40
codegen_flags: <defaults>
</compile_context>

<pallas_src>
import functools
import math

import jax
import jax.numpy as jnp
import numpy as np
from jax import lax
from jax.experimental import pallas as pl
from jax.experimental.pallas import tpu as pltpu

# ---------------- configuration (small, consistent with the module) ----------
MODEL_DIM = 32
NUM_HEAD = 4
NUM_SEED = 8
D_K = MODEL_DIM // NUM_HEAD
LN_EPS = 1e-5

# rows of the stacked small-parameter block
_ROW_BK, _ROW_BO, _ROW_GAMMA, _ROW_BETA = 0, 1, 2, 3


def _pmha_kernel(q_ref, s_ref, x_ref, wk_ref, wo_ref, vec_ref, out_ref, *,
                 block_b, seq_len):
    # q_ref  : [Ns, D]       precomputed S @ W_q + b_q (same for every batch)
    # s_ref  : [Ns, D]       seed vectors (residual)
    # x_ref  : [BB*T, D]     this block's tokens, batch folded into rows
    # wk_ref : [D, D], wo_ref: [D, D]
    # vec_ref: [4, D]        rows: b_k, b_o, ln_gamma, ln_beta
    # out_ref: [BB*Ns, D]
    q = q_ref[...].astype(jnp.float32)
    s = s_ref[...].astype(jnp.float32)
    wk = wk_ref[...].astype(jnp.float32)
    wo = wo_ref[...].astype(jnp.float32)
    vecs = vec_ref[...].astype(jnp.float32)
    bk = vecs[_ROW_BK:_ROW_BK + 1, :]
    bo = vecs[_ROW_BO:_ROW_BO + 1, :]
    gamma = vecs[_ROW_GAMMA:_ROW_GAMMA + 1, :]
    beta = vecs[_ROW_BETA:_ROW_BETA + 1, :]

    # K projection for all BB*T tokens of this block in one MXU matmul.
    xf = x_ref[...].astype(jnp.float32)                       # [BB*T, D]
    k_all = jnp.dot(xf, wk, preferred_element_type=jnp.float32) + bk
    # NOTE: reference module uses W_k for the value projection, so v == k
    # bit-exactly -> no separate V matmul.

    scale = jnp.float32(1.0 / math.sqrt(D_K))
    # Batch-invariant per-head pieces hoisted out of both loops.
    q_heads = [q[:, h * D_K:(h + 1) * D_K] * scale for h in range(NUM_HEAD)]
    wo_rows = [wo[h * D_K:(h + 1) * D_K, :] for h in range(NUM_HEAD)]
    y_init = s + bo                                           # residual + b_o

    outs = []
    for b in range(block_b):                                  # static, BB small
        kb = k_all[b * seq_len:(b + 1) * seq_len, :]          # [T, D] (== v_b)
        y = y_init
        for h in range(NUM_HEAD):
            kh = kb[:, h * D_K:(h + 1) * D_K]                 # [T, dk]
            # scores: contract last dims directly (no transpose relayout)
            sc = lax.dot_general(q_heads[h], kh, (((1,), (1,)), ((), ())),
                                 preferred_element_type=jnp.float32)  # [Ns, T]
            sc = sc - jnp.max(sc, axis=-1, keepdims=True)
            p = jnp.exp(sc)
            p = p * pl.reciprocal(jnp.sum(p, axis=-1, keepdims=True),
                                  approx=False)
            oh = jnp.dot(p, kh, preferred_element_type=jnp.float32)   # [Ns, dk]
            # fold W_o per head instead of concatenating heads along lanes
            y = y + jnp.dot(oh, wo_rows[h], preferred_element_type=jnp.float32)
        # dropout == identity (eval); LayerNorm over features (biased variance)
        mean = jnp.mean(y, axis=-1, keepdims=True)
        var = jnp.mean((y - mean) ** 2, axis=-1, keepdims=True)
        yn = (y - mean) * lax.rsqrt(var + LN_EPS)
        outs.append(yn * gamma + beta)

    # one contiguous block store for the whole batch block
    out_ref[...] = jnp.concatenate(outs, axis=0).astype(out_ref.dtype)


def _pick_block_b(batch):
    """Largest divisor of `batch` (<=64) that keeps at least 2 grid steps."""
    if batch < 2:
        return 1
    target = min(batch // 2, 64)
    for bb in range(target, 0, -1):
        if batch % bb == 0:
            return bb
    return 1


def pooling_multi_head_attention(x, params, block_b=None):
    """x: [B, T, D] -> [B, NUM_SEED, D]."""
    B, T, D = x.shape
    assert D == MODEL_DIM
    s, wq, bq, wk, bk, wo, bo, gamma, beta = params

    bb = _pick_block_b(B) if block_b is None else block_b
    assert B % bb == 0, "block_b must divide the batch size"

    # Q projection is identical for every batch element -> compute once here.
    q = (s.astype(jnp.float32) @ wq + bq).astype(jnp.float32)       # [Ns, D]
    # Stack the tiny (1, D) vectors into a single [4, D] block (one DMA).
    vecs = jnp.concatenate([bk, bo, gamma, beta], axis=0)           # [4, D]
    # Fold batch into rows so the kernel needs no 3-D reshape.
    x2 = x.reshape(B * T, D)

    grid = (B // bb,)
    fixed = lambda b: (0, 0)
    kernel = functools.partial(_pmha_kernel, block_b=bb, seq_len=T)

    out2 = pl.pallas_call(
        kernel,
        out_shape=jax.ShapeDtypeStruct((B * NUM_SEED, D), x.dtype),
        grid_spec=pltpu.PrefetchScalarGridSpec(
            num_scalar_prefetch=0,
            grid=grid,
            in_specs=[
                pl.BlockSpec((NUM_SEED, D), fixed),            # q (precomputed)
                pl.BlockSpec((NUM_SEED, D), fixed),            # S (residual)
                pl.BlockSpec((bb * T, D), lambda b: (b, 0)),   # tokens
                pl.BlockSpec((D, D), fixed),                   # W_k
                pl.BlockSpec((D, D), fixed),                   # W_o
                pl.BlockSpec((4, D), fixed),                   # bk/bo/gamma/beta
            ],
            out_specs=pl.BlockSpec((bb * NUM_SEED, D), lambda b: (b, 0)),
        ),
        compiler_params=pltpu.CompilerParams(
            dimension_semantics=("parallel",)),
    )(q, s, x2, wk, wo, vecs)
    return out2.reshape(B, NUM_SEED, D)


def _reference(x, params):
    """Pure-JAX reference of the same forward pass."""
    s, wq, bq, wk, bk, wo, bo, gamma, beta = params
    B, T, D = x.shape
    x32 = x.astype(jnp.float32)
    s32 = s.astype(jnp.float32)
    q = s32 @ wq + bq                                    # [Ns, D]
    k = x32 @ wk + bk                                    # [B, T, D]
    v = x32 @ wk + bk                                    # W_k used for v (as in module)
    qh = q.reshape(NUM_SEED, NUM_HEAD, D_K).transpose(1, 0, 2)          # [H, Ns, dk]
    kh = k.reshape(B, T, NUM_HEAD, D_K).transpose(0, 2, 1, 3)           # [B, H, T, dk]
    vh = v.reshape(B, T, NUM_HEAD, D_K).transpose(0, 2, 1, 3)
    sc = jnp.einsum("hnd,bhtd->bhnt", qh, kh) / math.sqrt(D_K)
    p = jax.nn.softmax(sc, axis=-1)
    o = jnp.einsum("bhnt,bhtd->bhnd", p, vh)                            # [B, H, Ns, dk]
    o = o.transpose(0, 2, 1, 3).reshape(B, NUM_SEED, D)
    y = o @ wo + bo + s32[None]
    mean = y.mean(-1, keepdims=True)
    var = ((y - mean) ** 2).mean(-1, keepdims=True)
    yn = (y - mean) * jax.lax.rsqrt(var + LN_EPS)
    return (yn * gamma + beta).astype(x.dtype)


def _init_params(key):
    ks = jax.random.split(key, 8)
    # Xavier-uniform for the seed parameter S: limit = sqrt(6/(Ns + D))
    lim_s = math.sqrt(6.0 / (NUM_SEED + MODEL_DIM))
    s = jax.random.uniform(ks[0], (NUM_SEED, MODEL_DIM), jnp.float32, -lim_s, lim_s)
    # Linear layers: kaiming-uniform-style bound 1/sqrt(fan_in), stored as [in, out]
    lim = 1.0 / math.sqrt(MODEL_DIM)
    wq = jax.random.uniform(ks[1], (MODEL_DIM, MODEL_DIM), jnp.float32, -lim, lim)
    bq = jax.random.uniform(ks[2], (1, MODEL_DIM), jnp.float32, -lim, lim)
    wk = jax.random.uniform(ks[3], (MODEL_DIM, MODEL_DIM), jnp.float32, -lim, lim)
    bk = jax.random.uniform(ks[4], (1, MODEL_DIM), jnp.float32, -lim, lim)
    wo = jax.random.uniform(ks[5], (MODEL_DIM, MODEL_DIM), jnp.float32, -lim, lim)
    bo = jax.random.uniform(ks[6], (1, MODEL_DIM), jnp.float32, -lim, lim)
    gamma = jnp.ones((1, MODEL_DIM), jnp.float32)
    beta = jnp.zeros((1, MODEL_DIM), jnp.float32)
    return (s, wq, bq, wk, bk, wo, bo, gamma, beta)


if __name__ == "__main__":
    key = jax.random.PRNGKey(0)
    pkey, xkey = jax.random.split(key)
    params = _init_params(pkey)

    B, T = 8, 16     # 8 batch elements -> block_b=4, grid=(2,) (dual-TC friendly)
    x = jax.random.normal(xkey, (B, T, MODEL_DIM), jnp.float32)

    out = pooling_multi_head_attention(x, params)
    out = jax.block_until_ready(out)

    ref = _reference(x, params)
    assert out.shape == (B, NUM_SEED, MODEL_DIM)
    np.testing.assert_allclose(np.asarray(out), np.asarray(ref), rtol=1e-4, atol=1e-4)
    print("KERNEL_OK")
</pallas_src>

<mosaic_0001>
module attributes {stable_mosaic.version = 11 : i64} {
  func.func @_pmha_kernel(%arg0: i32, %arg1: memref<8x32xf32, #tpu.memory_space<vmem>>, %arg2: memref<8x32xf32, #tpu.memory_space<vmem>>, %arg3: memref<64x32xf32, #tpu.memory_space<vmem>>, %arg4: memref<32x32xf32, #tpu.memory_space<vmem>>, %arg5: memref<32x32xf32, #tpu.memory_space<vmem>>, %arg6: memref<4x32xf32, #tpu.memory_space<vmem>>, %arg7: memref<32x32xf32, #tpu.memory_space<vmem>>) attributes {dimension_semantics = [#tpu.dimension_semantics<parallel>], iteration_bounds = array<i64: 2>, scalar_prefetch = 0 : i64, scratch_operands = 0 : i64, tpu.core_type = #tpu.core_type<tc>, window_params = [{pipeline_mode = #tpu.pipeline_mode<synchronous>, transform_indices = @transform_0, window_bounds = array<i64: 8, 32>}, {pipeline_mode = #tpu.pipeline_mode<synchronous>, transform_indices = @transform_1, window_bounds = array<i64: 8, 32>}, {transform_indices = @transform_2, window_bounds = array<i64: 64, 32>}, {pipeline_mode = #tpu.pipeline_mode<synchronous>, transform_indices = @transform_3, window_bounds = array<i64: 32, 32>}, {pipeline_mode = #tpu.pipeline_mode<synchronous>, transform_indices = @transform_4, window_bounds = array<i64: 32, 32>}, {pipeline_mode = #tpu.pipeline_mode<synchronous>, transform_indices = @transform_5, window_bounds = array<i64: 4, 32>}, {transform_indices = @transform_6, window_bounds = array<i64: 32, 32>}]} {
    %c0 = arith.constant 0 : index
    %c0_0 = arith.constant 0 : index
    %0 = vector.load %arg1[%c0, %c0_0] : memref<8x32xf32, #tpu.memory_space<vmem>>, vector<8x32xf32>
    %c0_1 = arith.constant 0 : index
    %c0_2 = arith.constant 0 : index
    %1 = vector.load %arg2[%c0_1, %c0_2] : memref<8x32xf32, #tpu.memory_space<vmem>>, vector<8x32xf32>
    %c0_3 = arith.constant 0 : index
    %c0_4 = arith.constant 0 : index
    %2 = vector.load %arg4[%c0_3, %c0_4] : memref<32x32xf32, #tpu.memory_space<vmem>>, vector<32x32xf32>
    %c0_5 = arith.constant 0 : index
    %c0_6 = arith.constant 0 : index
    %3 = vector.load %arg5[%c0_5, %c0_6] : memref<32x32xf32, #tpu.memory_space<vmem>>, vector<32x32xf32>
    %c0_7 = arith.constant 0 : index
    %c0_8 = arith.constant 0 : index
    %4 = vector.load %arg6[%c0_7, %c0_8] : memref<4x32xf32, #tpu.memory_space<vmem>>, vector<4x32xf32>
    %5 = vector.extract_strided_slice %4 {offsets = [0, 0], sizes = [1, 32], strides = [1, 1]} : vector<4x32xf32> to vector<1x32xf32>
    %6 = vector.extract_strided_slice %4 {offsets = [1, 0], sizes = [1, 32], strides = [1, 1]} : vector<4x32xf32> to vector<1x32xf32>
    %7 = vector.extract_strided_slice %4 {offsets = [2, 0], sizes = [1, 32], strides = [1, 1]} : vector<4x32xf32> to vector<1x32xf32>
    %8 = vector.extract_strided_slice %4 {offsets = [3, 0], sizes = [1, 32], strides = [1, 1]} : vector<4x32xf32> to vector<1x32xf32>
    %c0_9 = arith.constant 0 : index
    %c0_10 = arith.constant 0 : index
    %9 = vector.load %arg3[%c0_9, %c0_10] : memref<64x32xf32, #tpu.memory_space<vmem>>, vector<64x32xf32>
    %cst = arith.constant dense<0.000000e+00> : vector<64x32xf32>
    %10 = tpu.matmul %9, %2, %cst {dimension_numbers = #tpu.dot_dimension_numbers<[1], [0], [0], [1], [0, 0, 1, 1], [], []>} : vector<64x32xf32>, vector<32x32xf32>, vector<64x32xf32> -> vector<64x32xf32>
    %11 = vector.broadcast %5 : vector<1x32xf32> to vector<64x32xf32>
    %12 = arith.addf %10, %11 : vector<64x32xf32>
    %13 = vector.extract_strided_slice %0 {offsets = [0, 0], sizes = [8, 8], strides = [1, 1]} : vector<8x32xf32> to vector<8x8xf32>
    %cst_11 = arith.constant 0.353553385 : f32
    %14 = vector.broadcast %cst_11 : f32 to vector<8x8xf32>
    %15 = arith.mulf %13, %14 : vector<8x8xf32>
    %16 = vector.extract_strided_slice %0 {offsets = [0, 8], sizes = [8, 8], strides = [1, 1]} : vector<8x32xf32> to vector<8x8xf32>
    %cst_12 = arith.constant 0.353553385 : f32
    %17 = vector.broadcast %cst_12 : f32 to vector<8x8xf32>
    %18 = arith.mulf %16, %17 : vector<8x8xf32>
    %19 = vector.extract_strided_slice %0 {offsets = [0, 16], sizes = [8, 8], strides = [1, 1]} : vector<8x32xf32> to vector<8x8xf32>
    %cst_13 = arith.constant 0.353553385 : f32
    %20 = vector.broadcast %cst_13 : f32 to vector<8x8xf32>
    %21 = arith.mulf %19, %20 : vector<8x8xf32>
    %22 = vector.extract_strided_slice %0 {offsets = [0, 24], sizes = [8, 8], strides = [1, 1]} : vector<8x32xf32> to vector<8x8xf32>
    %cst_14 = arith.constant 0.353553385 : f32
    %23 = vector.broadcast %cst_14 : f32 to vector<8x8xf32>
    %24 = arith.mulf %22, %23 : vector<8x8xf32>
    %25 = vector.extract_strided_slice %3 {offsets = [0, 0], sizes = [8, 32], strides = [1, 1]} : vector<32x32xf32> to vector<8x32xf32>
    %26 = vector.extract_strided_slice %3 {offsets = [8, 0], sizes = [8, 32], strides = [1, 1]} : vector<32x32xf32> to vector<8x32xf32>
    %27 = vector.extract_strided_slice %3 {offsets = [16, 0], sizes = [8, 32], strides = [1, 1]} : vector<32x32xf32> to vector<8x32xf32>
    %28 = vector.extract_strided_slice %3 {offsets = [24, 0], sizes = [8, 32], strides = [1, 1]} : vector<32x32xf32> to vector<8x32xf32>
    %29 = vector.broadcast %6 : vector<1x32xf32> to vector<8x32xf32>
    %30 = arith.addf %1, %29 : vector<8x32xf32>
    %31 = vector.extract_strided_slice %12 {offsets = [0, 0], sizes = [16, 32], strides = [1, 1]} : vector<64x32xf32> to vector<16x32xf32>
    %32 = vector.extract_strided_slice %31 {offsets = [0, 0], sizes = [16, 8], strides = [1, 1]} : vector<16x32xf32> to vector<16x8xf32>
    %cst_15 = arith.constant dense<0.000000e+00> : vector<8x16xf32>
    %33 = tpu.matmul %15, %32, %cst_15 {dimension_numbers = #tpu.dot_dimension_numbers<[1], [1], [0], [0], [0, 0, 1, 0], [], []>} : vector<8x8xf32>, vector<16x8xf32>, vector<8x16xf32> -> vector<8x16xf32>
    %cst_16 = arith.constant dense<0xFF800000> : vector<8xf32>
    %34 = vector.multi_reduction <maximumf>, %33, %cst_16 [1] : vector<8x16xf32> to vector<8xf32>
    %35 = vector.shape_cast %34 : vector<8xf32> to vector<8x1xf32>
    %36 = vector.broadcast %35 : vector<8x1xf32> to vector<8x16xf32>
    %37 = arith.subf %33, %36 : vector<8x16xf32>
    %38 = math.exp %37 : vector<8x16xf32>
    %cst_17 = arith.constant dense<0.000000e+00> : vector<8xf32>
    %39 = vector.multi_reduction <add>, %38, %cst_17 [1] : vector<8x16xf32> to vector<8xf32>
    %40 = vector.shape_cast %39 : vector<8xf32> to vector<8x1xf32>
    %41 = tpu.reciprocal %40 : vector<8x1xf32> -> vector<8x1xf32>
    %42 = vector.broadcast %41 : vector<8x1xf32> to vector<8x16xf32>
    %43 = arith.mulf %38, %42 : vector<8x16xf32>
    %cst_18 = arith.constant dense<0.000000e+00> : vector<8x8xf32>
    %44 = tpu.matmul %43, %32, %cst_18 {dimension_numbers = #tpu.dot_dimension_numbers<[1], [0], [0], [1], [0, 0, 1, 1], [], []>} : vector<8x16xf32>, vector<16x8xf32>, vector<8x8xf32> -> vector<8x8xf32>
    %cst_19 = arith.constant dense<0.000000e+00> : vector<8x32xf32>
    %45 = tpu.matmul %44, %25, %cst_19 {dimension_numbers = #tpu.dot_dimension_numbers<[1], [0], [0], [1], [0, 0, 1, 1], [], []>} : vector<8x8xf32>, vector<8x32xf32>, vector<8x32xf32> -> vector<8x32xf32>
    %46 = arith.addf %30, %45 : vector<8x32xf32>
    %47 = vector.extract_strided_slice %31 {offsets = [0, 8], sizes = [16, 8], strides = [1, 1]} : vector<16x32xf32> to vector<16x8xf32>
    %cst_20 = arith.constant dense<0.000000e+00> : vector<8x16xf32>
    %48 = tpu.matmul %18, %47, %cst_20 {dimension_numbers = #tpu.dot_dimension_numbers<[1], [1], [0], [0], [0, 0, 1, 0], [], []>} : vector<8x8xf32>, vector<16x8xf32>, vector<8x16xf32> -> vector<8x16xf32>
    %cst_21 = arith.constant dense<0xFF800000> : vector<8xf32>
    %49 = vector.multi_reduction <maximumf>, %48, %cst_21 [1] : vector<8x16xf32> to vector<8xf32>
    %50 = vector.shape_cast %49 : vector<8xf32> to vector<8x1xf32>
    %51 = vector.broadcast %50 : vector<8x1xf32> to vector<8x16xf32>
    %52 = arith.subf %48, %51 : vector<8x16xf32>
    %53 = math.exp %52 : vector<8x16xf32>
    %cst_22 = arith.constant dense<0.000000e+00> : vector<8xf32>
    %54 = vector.multi_reduction <add>, %53, %cst_22 [1] : vector<8x16xf32> to vector<8xf32>
    %55 = vector.shape_cast %54 : vector<8xf32> to vector<8x1xf32>
    %56 = tpu.reciprocal %55 : vector<8x1xf32> -> vector<8x1xf32>
    %57 = vector.broadcast %56 : vector<8x1xf32> to vector<8x16xf32>
    %58 = arith.mulf %53, %57 : vector<8x16xf32>
    %cst_23 = arith.constant dense<0.000000e+00> : vector<8x8xf32>
    %59 = tpu.matmul %58, %47, %cst_23 {dimension_numbers = #tpu.dot_dimension_numbers<[1], [0], [0], [1], [0, 0, 1, 1], [], []>} : vector<8x16xf32>, vector<16x8xf32>, vector<8x8xf32> -> vector<8x8xf32>
    %cst_24 = arith.constant dense<0.000000e+00> : vector<8x32xf32>
    %60 = tpu.matmul %59, %26, %cst_24 {dimension_numbers = #tpu.dot_dimension_numbers<[1], [0], [0], [1], [0, 0, 1, 1], [], []>} : vector<8x8xf32>, vector<8x32xf32>, vector<8x32xf32> -> vector<8x32xf32>
    %61 = arith.addf %46, %60 : vector<8x32xf32>
    %62 = vector.extract_strided_slice %31 {offsets = [0, 16], sizes = [16, 8], strides = [1, 1]} : vector<16x32xf32> to vector<16x8xf32>
    %cst_25 = arith.constant dense<0.000000e+00> : vector<8x16xf32>
    %63 = tpu.matmul %21, %62, %cst_25 {dimension_numbers = #tpu.dot_dimension_numbers<[1], [1], [0], [0], [0, 0, 1, 0], [], []>} : vector<8x8xf32>, vector<16x8xf32>, vector<8x16xf32> -> vector<8x16xf32>
    %cst_26 = arith.constant dense<0xFF800000> : vector<8xf32>
    %64 = vector.multi_reduction <maximumf>, %63, %cst_26 [1] : vector<8x16xf32> to vector<8xf32>
    %65 = vector.shape_cast %64 : vector<8xf32> to vector<8x1xf32>
    %66 = vector.broadcast %65 : vector<8x1xf32> to vector<8x16xf32>
    %67 = arith.subf %63, %66 : vector<8x16xf32>
    %68 = math.exp %67 : vector<8x16xf32>
    %cst_27 = arith.constant dense<0.000000e+00> : vector<8xf32>
    %69 = vector.multi_reduction <add>, %68, %cst_27 [1] : vector<8x16xf32> to vector<8xf32>
    %70 = vector.shape_cast %69 : vector<8xf32> to vector<8x1xf32>
    %71 = tpu.reciprocal %70 : vector<8x1xf32> -> vector<8x1xf32>
    %72 = vector.broadcast %71 : vector<8x1xf32> to vector<8x16xf32>
    %73 = arith.mulf %68, %72 : vector<8x16xf32>
    %cst_28 = arith.constant dense<0.000000e+00> : vector<8x8xf32>
    %74 = tpu.matmul %73, %62, %cst_28 {dimension_numbers = #tpu.dot_dimension_numbers<[1], [0], [0], [1], [0, 0, 1, 1], [], []>} : vector<8x16xf32>, vector<16x8xf32>, vector<8x8xf32> -> vector<8x8xf32>
    %cst_29 = arith.constant dense<0.000000e+00> : vector<8x32xf32>
    %75 = tpu.matmul %74, %27, %cst_29 {dimension_numbers = #tpu.dot_dimension_numbers<[1], [0], [0], [1], [0, 0, 1, 1], [], []>} : vector<8x8xf32>, vector<8x32xf32>, vector<8x32xf32> -> vector<8x32xf32>
    %76 = arith.addf %61, %75 : vector<8x32xf32>
    %77 = vector.extract_strided_slice %31 {offsets = [0, 24], sizes = [16, 8], strides = [1, 1]} : vector<16x32xf32> to vector<16x8xf32>
    %cst_30 = arith.constant dense<0.000000e+00> : vector<8x16xf32>
    %78 = tpu.matmul %24, %77, %cst_30 {dimension_numbers = #tpu.dot_dimension_numbers<[1], [1], [0], [0], [0, 0, 1, 0], [], []>} : vector<8x8xf32>, vector<16x8xf32>, vector<8x16xf32> -> vector<8x16xf32>
    %cst_31 = arith.constant dense<0xFF800000> : vector<8xf32>
    %79 = vector.multi_reduction <maximumf>, %78, %cst_31 [1] : vector<8x16xf32> to vector<8xf32>
    %80 = vector.shape_cast %79 : vector<8xf32> to vector<8x1xf32>
    %81 = vector.broadcast %80 : vector<8x1xf32> to vector<8x16xf32>
    %82 = arith.subf %78, %81 : vector<8x16xf32>
    %83 = math.exp %82 : vector<8x16xf32>
    %cst_32 = arith.constant dense<0.000000e+00> : vector<8xf32>
    %84 = vector.multi_reduction <add>, %83, %cst_32 [1] : vector<8x16xf32> to vector<8xf32>
    %85 = vector.shape_cast %84 : vector<8xf32> to vector<8x1xf32>
    %86 = tpu.reciprocal %85 : vector<8x1xf32> -> vector<8x1xf32>
    %87 = vector.broadcast %86 : vector<8x1xf32> to vector<8x16xf32>
    %88 = arith.mulf %83, %87 : vector<8x16xf32>
    %cst_33 = arith.constant dense<0.000000e+00> : vector<8x8xf32>
    %89 = tpu.matmul %88, %77, %cst_33 {dimension_numbers = #tpu.dot_dimension_numbers<[1], [0], [0], [1], [0, 0, 1, 1], [], []>} : vector<8x16xf32>, vector<16x8xf32>, vector<8x8xf32> -> vector<8x8xf32>
    %cst_34 = arith.constant dense<0.000000e+00> : vector<8x32xf32>
    %90 = tpu.matmul %89, %28, %cst_34 {dimension_numbers = #tpu.dot_dimension_numbers<[1], [0], [0], [1], [0, 0, 1, 1], [], []>} : vector<8x8xf32>, vector<8x32xf32>, vector<8x32xf32> -> vector<8x32xf32>
    %91 = arith.addf %76, %90 : vector<8x32xf32>
    %cst_35 = arith.constant dense<0.000000e+00> : vector<8xf32>
    %92 = vector.multi_reduction <add>, %91, %cst_35 [1] : vector<8x32xf32> to vector<8xf32>
    %93 = vector.shape_cast %92 : vector<8xf32> to vector<8x1xf32>
    %cst_36 = arith.constant 3.200000e+01 : f32
    %94 = vector.broadcast %cst_36 : f32 to vector<8x1xf32>
    %95 = arith.divf %93, %94 : vector<8x1xf32>
    %96 = vector.broadcast %95 : vector<8x1xf32> to vector<8x32xf32>
    %97 = arith.subf %91, %96 : vector<8x32xf32>
    %98 = arith.mulf %97, %97 : vector<8x32xf32>
    %cst_37 = arith.constant dense<0.000000e+00> : vector<8xf32>
    %99 = vector.multi_reduction <add>, %98, %cst_37 [1] : vector<8x32xf32> to vector<8xf32>
    %100 = vector.shape_cast %99 : vector<8xf32> to vector<8x1xf32>
    %cst_38 = arith.constant 3.200000e+01 : f32
    %101 = vector.broadcast %cst_38 : f32 to vector<8x1xf32>
    %102 = arith.divf %100, %101 : vector<8x1xf32>
    %103 = vector.broadcast %95 : vector<8x1xf32> to vector<8x32xf32>
    %104 = arith.subf %91, %103 : vector<8x32xf32>
    %cst_39 = arith.constant 9.99999974E-6 : f32
    %105 = vector.broadcast %cst_39 : f32 to vector<8x1xf32>
    %106 = arith.addf %102, %105 : vector<8x1xf32>
    %107 = math.rsqrt %106 : vector<8x1xf32>
    %108 = vector.broadcast %107 : vector<8x1xf32> to vector<8x32xf32>
    %109 = arith.mulf %104, %108 : vector<8x32xf32>
    %110 = vector.broadcast %7 : vector<1x32xf32> to vector<8x32xf32>
    %111 = arith.mulf %109, %110 : vector<8x32xf32>
    %112 = vector.broadcast %8 : vector<1x32xf32> to vector<8x32xf32>
    %113 = arith.addf %111, %112 : vector<8x32xf32>
    %114 = vector.extract_strided_slice %12 {offsets = [16, 0], sizes = [16, 32], strides = [1, 1]} : vector<64x32xf32> to vector<16x32xf32>
    %115 = vector.extract_strided_slice %114 {offsets = [0, 0], sizes = [16, 8], strides = [1, 1]} : vector<16x32xf32> to vector<16x8xf32>
    %cst_40 = arith.constant dense<0.000000e+00> : vector<8x16xf32>
    %116 = tpu.matmul %15, %115, %cst_40 {dimension_numbers = #tpu.dot_dimension_numbers<[1], [1], [0], [0], [0, 0, 1, 0], [], []>} : vector<8x8xf32>, vector<16x8xf32>, vector<8x16xf32> -> vector<8x16xf32>
    %cst_41 = arith.constant dense<0xFF800000> : vector<8xf32>
    %117 = vector.multi_reduction <maximumf>, %116, %cst_41 [1] : vector<8x16xf32> to vector<8xf32>
    %118 = vector.shape_cast %117 : vector<8xf32> to vector<8x1xf32>
    %119 = vector.broadcast %118 : vector<8x1xf32> to vector<8x16xf32>
    %120 = arith.subf %116, %119 : vector<8x16xf32>
    %121 = math.exp %120 : vector<8x16xf32>
    %cst_42 = arith.constant dense<0.000000e+00> : vector<8xf32>
    %122 = vector.multi_reduction <add>, %121, %cst_42 [1] : vector<8x16xf32> to vector<8xf32>
    %123 = vector.shape_cast %122 : vector<8xf32> to vector<8x1xf32>
    %124 = tpu.reciprocal %123 : vector<8x1xf32> -> vector<8x1xf32>
    %125 = vector.broadcast %124 : vector<8x1xf32> to vector<8x16xf32>
    %126 = arith.mulf %121, %125 : vector<8x16xf32>
    %cst_43 = arith.constant dense<0.000000e+00> : vector<8x8xf32>
    %127 = tpu.matmul %126, %115, %cst_43 {dimension_numbers = #tpu.dot_dimension_numbers<[1], [0], [0], [1], [0, 0, 1, 1], [], []>} : vector<8x16xf32>, vector<16x8xf32>, vector<8x8xf32> -> vector<8x8xf32>
    %cst_44 = arith.constant dense<0.000000e+00> : vector<8x32xf32>
    %128 = tpu.matmul %127, %25, %cst_44 {dimension_numbers = #tpu.dot_dimension_numbers<[1], [0], [0], [1], [0, 0, 1, 1], [], []>} : vector<8x8xf32>, vector<8x32xf32>, vector<8x32xf32> -> vector<8x32xf32>
    %129 = arith.addf %30, %128 : vector<8x32xf32>
    %130 = vector.extract_strided_slice %114 {offsets = [0, 8], sizes = [16, 8], strides = [1, 1]} : vector<16x32xf32> to vector<16x8xf32>
    %cst_45 = arith.constant dense<0.000000e+00> : vector<8x16xf32>
    %131 = tpu.matmul %18, %130, %cst_45 {dimension_numbers = #tpu.dot_dimension_numbers<[1], [1], [0], [0], [0, 0, 1, 0], [], []>} : vector<8x8xf32>, vector<16x8xf32>, vector<8x16xf32> -> vector<8x16xf32>
    %cst_46 = arith.constant dense<0xFF800000> : vector<8xf32>
    %132 = vector.multi_reduction <maximumf>, %131, %cst_46 [1] : vector<8x16xf32> to vector<8xf32>
    %133 = vector.shape_cast %132 : vector<8xf32> to vector<8x1xf32>
    %134 = vector.broadcast %133 : vector<8x1xf32> to vector<8x16xf32>
    %135 = arith.subf %131, %134 : vector<8x16xf32>
    %136 = math.exp %135 : vector<8x16xf32>
    %cst_47 = arith.constant dense<0.000000e+00> : vector<8xf32>
    %137 = vector.multi_reduction <add>, %136, %cst_47 [1] : vector<8x16xf32> to vector<8xf32>
    %138 = vector.shape_cast %137 : vector<8xf32> to vector<8x1xf32>
    %139 = tpu.reciprocal %138 : vector<8x1xf32> -> vector<8x1xf32>
    %140 = vector.broadcast %139 : vector<8x1xf32> to vector<8x16xf32>
    %141 = arith.mulf %136, %140 : vector<8x16xf32>
    %cst_48 = arith.constant dense<0.000000e+00> : vector<8x8xf32>
    %142 = tpu.matmul %141, %130, %cst_48 {dimension_numbers = #tpu.dot_dimension_numbers<[1], [0], [0], [1], [0, 0, 1, 1], [], []>} : vector<8x16xf32>, vector<16x8xf32>, vector<8x8xf32> -> vector<8x8xf32>
    %cst_49 = arith.constant dense<0.000000e+00> : vector<8x32xf32>
    %143 = tpu.matmul %142, %26, %cst_49 {dimension_numbers = #tpu.dot_dimension_numbers<[1], [0], [0], [1], [0, 0, 1, 1], [], []>} : vector<8x8xf32>, vector<8x32xf32>, vector<8x32xf32> -> vector<8x32xf32>
    %144 = arith.addf %129, %143 : vector<8x32xf32>
    %145 = vector.extract_strided_slice %114 {offsets = [0, 16], sizes = [16, 8], strides = [1, 1]} : vector<16x32xf32> to vector<16x8xf32>
    %cst_50 = arith.constant dense<0.000000e+00> : vector<8x16xf32>
    %146 = tpu.matmul %21, %145, %cst_50 {dimension_numbers = #tpu.dot_dimension_numbers<[1], [1], [0], [0], [0, 0, 1, 0], [], []>} : vector<8x8xf32>, vector<16x8xf32>, vector<8x16xf32> -> vector<8x16xf32>
    %cst_51 = arith.constant dense<0xFF800000> : vector<8xf32>
    %147 = vector.multi_reduction <maximumf>, %146, %cst_51 [1] : vector<8x16xf32> to vector<8xf32>
    %148 = vector.shape_cast %147 : vector<8xf32> to vector<8x1xf32>
    %149 = vector.broadcast %148 : vector<8x1xf32> to vector<8x16xf32>
    %150 = arith.subf %146, %149 : vector<8x16xf32>
    %151 = math.exp %150 : vector<8x16xf32>
    %cst_52 = arith.constant dense<0.000000e+00> : vector<8xf32>
    %152 = vector.multi_reduction <add>, %151, %cst_52 [1] : vector<8x16xf32> to vector<8xf32>
    %153 = vector.shape_cast %152 : vector<8xf32> to vector<8x1xf32>
    %154 = tpu.reciprocal %153 : vector<8x1xf32> -> vector<8x1xf32>
    %155 = vector.broadcast %154 : vector<8x1xf32> to vector<8x16xf32>
    %156 = arith.mulf %151, %155 : vector<8x16xf32>
    %cst_53 = arith.constant dense<0.000000e+00> : vector<8x8xf32>
    %157 = tpu.matmul %156, %145, %cst_53 {dimension_numbers = #tpu.dot_dimension_numbers<[1], [0], [0], [1], [0, 0, 1, 1], [], []>} : vector<8x16xf32>, vector<16x8xf32>, vector<8x8xf32> -> vector<8x8xf32>
    %cst_54 = arith.constant dense<0.000000e+00> : vector<8x32xf32>
    %158 = tpu.matmul %157, %27, %cst_54 {dimension_numbers = #tpu.dot_dimension_numbers<[1], [0], [0], [1], [0, 0, 1, 1], [], []>} : vector<8x8xf32>, vector<8x32xf32>, vector<8x32xf32> -> vector<8x32xf32>
    %159 = arith.addf %144, %158 : vector<8x32xf32>
    %160 = vector.extract_strided_slice %114 {offsets = [0, 24], sizes = [16, 8], strides = [1, 1]} : vector<16x32xf32> to vector<16x8xf32>
    %cst_55 = arith.constant dense<0.000000e+00> : vector<8x16xf32>
    %161 = tpu.matmul %24, %160, %cst_55 {dimension_numbers = #tpu.dot_dimension_numbers<[1], [1], [0], [0], [0, 0, 1, 0], [], []>} : vector<8x8xf32>, vector<16x8xf32>, vector<8x16xf32> -> vector<8x16xf32>
    %cst_56 = arith.constant dense<0xFF800000> : vector<8xf32>
    %162 = vector.multi_reduction <maximumf>, %161, %cst_56 [1] : vector<8x16xf32> to vector<8xf32>
    %163 = vector.shape_cast %162 : vector<8xf32> to vector<8x1xf32>
    %164 = vector.broadcast %163 : vector<8x1xf32> to vector<8x16xf32>
    %165 = arith.subf %161, %164 : vector<8x16xf32>
    %166 = math.exp %165 : vector<8x16xf32>
    %cst_57 = arith.constant dense<0.000000e+00> : vector<8xf32>
    %167 = vector.multi_reduction <add>, %166, %cst_57 [1] : vector<8x16xf32> to vector<8xf32>
    %168 = vector.shape_cast %167 : vector<8xf32> to vector<8x1xf32>
    %169 = tpu.reciprocal %168 : vector<8x1xf32> -> vector<8x1xf32>
    %170 = vector.broadcast %169 : vector<8x1xf32> to vector<8x16xf32>
    %171 = arith.mulf %166, %170 : vector<8x16xf32>
    %cst_58 = arith.constant dense<0.000000e+00> : vector<8x8xf32>
    %172 = tpu.matmul %171, %160, %cst_58 {dimension_numbers = #tpu.dot_dimension_numbers<[1], [0], [0], [1], [0, 0, 1, 1], [], []>} : vector<8x16xf32>, vector<16x8xf32>, vector<8x8xf32> -> vector<8x8xf32>
    %cst_59 = arith.constant dense<0.000000e+00> : vector<8x32xf32>
    %173 = tpu.matmul %172, %28, %cst_59 {dimension_numbers = #tpu.dot_dimension_numbers<[1], [0], [0], [1], [0, 0, 1, 1], [], []>} : vector<8x8xf32>, vector<8x32xf32>, vector<8x32xf32> -> vector<8x32xf32>
    %174 = arith.addf %159, %173 : vector<8x32xf32>
    %cst_60 = arith.constant dense<0.000000e+00> : vector<8xf32>
    %175 = vector.multi_reduction <add>, %174, %cst_60 [1] : vector<8x32xf32> to vector<8xf32>
    %176 = vector.shape_cast %175 : vector<8xf32> to vector<8x1xf32>
    %cst_61 = arith.constant 3.200000e+01 : f32
    %177 = vector.broadcast %cst_61 : f32 to vector<8x1xf32>
    %178 = arith.divf %176, %177 : vector<8x1xf32>
    %179 = vector.broadcast %178 : vector<8x1xf32> to vector<8x32xf32>
    %180 = arith.subf %174, %179 : vector<8x32xf32>
    %181 = arith.mulf %180, %180 : vector<8x32xf32>
    %cst_62 = arith.constant dense<0.000000e+00> : vector<8xf32>
    %182 = vector.multi_reduction <add>, %181, %cst_62 [1] : vector<8x32xf32> to vector<8xf32>
    %183 = vector.shape_cast %182 : vector<8xf32> to vector<8x1xf32>
    %cst_63 = arith.constant 3.200000e+01 : f32
    %184 = vector.broadcast %cst_63 : f32 to vector<8x1xf32>
    %185 = arith.divf %183, %184 : vector<8x1xf32>
    %186 = vector.broadcast %178 : vector<8x1xf32> to vector<8x32xf32>
    %187 = arith.subf %174, %186 : vector<8x32xf32>
    %cst_64 = arith.constant 9.99999974E-6 : f32
    %188 = vector.broadcast %cst_64 : f32 to vector<8x1xf32>
    %189 = arith.addf %185, %188 : vector<8x1xf32>
    %190 = math.rsqrt %189 : vector<8x1xf32>
    %191 = vector.broadcast %190 : vector<8x1xf32> to vector<8x32xf32>
    %192 = arith.mulf %187, %191 : vector<8x32xf32>
    %193 = vector.broadcast %7 : vector<1x32xf32> to vector<8x32xf32>
    %194 = arith.mulf %192, %193 : vector<8x32xf32>
    %195 = vector.broadcast %8 : vector<1x32xf32> to vector<8x32xf32>
    %196 = arith.addf %194, %195 : vector<8x32xf32>
    %197 = vector.extract_strided_slice %12 {offsets = [32, 0], sizes = [16, 32], strides = [1, 1]} : vector<64x32xf32> to vector<16x32xf32>
    %198 = vector.extract_strided_slice %197 {offsets = [0, 0], sizes = [16, 8], strides = [1, 1]} : vector<16x32xf32> to vector<16x8xf32>
    %cst_65 = arith.constant dense<0.000000e+00> : vector<8x16xf32>
    %199 = tpu.matmul %15, %198, %cst_65 {dimension_numbers = #tpu.dot_dimension_numbers<[1], [1], [0], [0], [0, 0, 1, 0], [], []>} : vector<8x8xf32>, vector<16x8xf32>, vector<8x16xf32> -> vector<8x16xf32>
    %cst_66 = arith.constant dense<0xFF800000> : vector<8xf32>
    %200 = vector.multi_reduction <maximumf>, %199, %cst_66 [1] : vector<8x16xf32> to vector<8xf32>
    %201 = vector.shape_cast %200 : vector<8xf32> to vector<8x1xf32>
    %202 = vector.broadcast %201 : vector<8x1xf32> to vector<8x16xf32>
    %203 = arith.subf %199, %202 : vector<8x16xf32>
    %204 = math.exp %203 : vector<8x16xf32>
    %cst_67 = arith.constant dense<0.000000e+00> : vector<8xf32>
    %205 = vector.multi_reduction <add>, %204, %cst_67 [1] : vector<8x16xf32> to vector<8xf32>
    %206 = vector.shape_cast %205 : vector<8xf32> to vector<8x1xf32>
    %207 = tpu.reciprocal %206 : vector<8x1xf32> -> vector<8x1xf32>
    %208 = vector.broadcast %207 : vector<8x1xf32> to vector<8x16xf32>
    %209 = arith.mulf %204, %208 : vector<8x16xf32>
    %cst_68 = arith.constant dense<0.000000e+00> : vector<8x8xf32>
    %210 = tpu.matmul %209, %198, %cst_68 {dimension_numbers = #tpu.dot_dimension_numbers<[1], [0], [0], [1], [0, 0, 1, 1], [], []>} : vector<8x16xf32>, vector<16x8xf32>, vector<8x8xf32> -> vector<8x8xf32>
    %cst_69 = arith.constant dense<0.000000e+00> : vector<8x32xf32>
    %211 = tpu.matmul %210, %25, %cst_69 {dimension_numbers = #tpu.dot_dimension_numbers<[1], [0], [0], [1], [0, 0, 1, 1], [], []>} : vector<8x8xf32>, vector<8x32xf32>, vector<8x32xf32> -> vector<8x32xf32>
    %212 = arith.addf %30, %211 : vector<8x32xf32>
    %213 = vector.extract_strided_slice %197 {offsets = [0, 8], sizes = [16, 8], strides = [1, 1]} : vector<16x32xf32> to vector<16x8xf32>
    %cst_70 = arith.constant dense<0.000000e+00> : vector<8x16xf32>
    %214 = tpu.matmul %18, %213, %cst_70 {dimension_numbers = #tpu.dot_dimension_numbers<[1], [1], [0], [0], [0, 0, 1, 0], [], []>} : vector<8x8xf32>, vector<16x8xf32>, vector<8x16xf32> -> vector<8x16xf32>
    %cst_71 = arith.constant dense<0xFF800000> : vector<8xf32>
    %215 = vector.multi_reduction <maximumf>, %214, %cst_71 [1] : vector<8x16xf32> to vector<8xf32>
    %216 = vector.shape_cast %215 : vector<8xf32> to vector<8x1xf32>
    %217 = vector.broadcast %216 : vector<8x1xf32> to vector<8x16xf32>
    %218 = arith.subf %214, %217 : vector<8x16xf32>
    %219 = math.exp %218 : vector<8x16xf32>
    %cst_72 = arith.constant dense<0.000000e+00> : vector<8xf32>
    %220 = vector.multi_reduction <add>, %219, %cst_72 [1] : vector<8x16xf32> to vector<8xf32>
    %221 = vector.shape_cast %220 : vector<8xf32> to vector<8x1xf32>
    %222 = tpu.reciprocal %221 : vector<8x1xf32> -> vector<8x1xf32>
    %223 = vector.broadcast %222 : vector<8x1xf32> to vector<8x16xf32>
    %224 = arith.mulf %219, %223 : vector<8x16xf32>
    %cst_73 = arith.constant dense<0.000000e+00> : vector<8x8xf32>
    %225 = tpu.matmul %224, %213, %cst_73 {dimension_numbers = #tpu.dot_dimension_numbers<[1], [0], [0], [1], [0, 0, 1, 1], [], []>} : vector<8x16xf32>, vector<16x8xf32>, vector<8x8xf32> -> vector<8x8xf32>
    %cst_74 = arith.constant dense<0.000000e+00> : vector<8x32xf32>
    %226 = tpu.matmul %225, %26, %cst_74 {dimension_numbers = #tpu.dot_dimension_numbers<[1], [0], [0], [1], [0, 0, 1, 1], [], []>} : vector<8x8xf32>, vector<8x32xf32>, vector<8x32xf32> -> vector<8x32xf32>
    %227 = arith.addf %212, %226 : vector<8x32xf32>
    %228 = vector.extract_strided_slice %197 {offsets = [0, 16], sizes = [16, 8], strides = [1, 1]} : vector<16x32xf32> to vector<16x8xf32>
    %cst_75 = arith.constant dense<0.000000e+00> : vector<8x16xf32>
    %229 = tpu.matmul %21, %228, %cst_75 {dimension_numbers = #tpu.dot_dimension_numbers<[1], [1], [0], [0], [0, 0, 1, 0], [], []>} : vector<8x8xf32>, vector<16x8xf32>, vector<8x16xf32> -> vector<8x16xf32>
    %cst_76 = arith.constant dense<0xFF800000> : vector<8xf32>
    %230 = vector.multi_reduction <maximumf>, %229, %cst_76 [1] : vector<8x16xf32> to vector<8xf32>
    %231 = vector.shape_cast %230 : vector<8xf32> to vector<8x1xf32>
    %232 = vector.broadcast %231 : vector<8x1xf32> to vector<8x16xf32>
    %233 = arith.subf %229, %232 : vector<8x16xf32>
    %234 = math.exp %233 : vector<8x16xf32>
    %cst_77 = arith.constant dense<0.000000e+00> : vector<8xf32>
    %235 = vector.multi_reduction <add>, %234, %cst_77 [1] : vector<8x16xf32> to vector<8xf32>
    %236 = vector.shape_cast %235 : vector<8xf32> to vector<8x1xf32>
    %237 = tpu.reciprocal %236 : vector<8x1xf32> -> vector<8x1xf32>
    %238 = vector.broadcast %237 : vector<8x1xf32> to vector<8x16xf32>
    %239 = arith.mulf %234, %238 : vector<8x16xf32>
    %cst_78 = arith.constant dense<0.000000e+00> : vector<8x8xf32>
    %240 = tpu.matmul %239, %228, %cst_78 {dimension_numbers = #tpu.dot_dimension_numbers<[1], [0], [0], [1], [0, 0, 1, 1], [], []>} : vector<8x16xf32>, vector<16x8xf32>, vector<8x8xf32> -> vector<8x8xf32>
    %cst_79 = arith.constant dense<0.000000e+00> : vector<8x32xf32>
    %241 = tpu.matmul %240, %27, %cst_79 {dimension_numbers = #tpu.dot_dimension_numbers<[1], [0], [0], [1], [0, 0, 1, 1], [], []>} : vector<8x8xf32>, vector<8x32xf32>, vector<8x32xf32> -> vector<8x32xf32>
    %242 = arith.addf %227, %241 : vector<8x32xf32>
    %243 = vector.extract_strided_slice %197 {offsets = [0, 24], sizes = [16, 8], strides = [1, 1]} : vector<16x32xf32> to vector<16x8xf32>
    %cst_80 = arith.constant dense<0.000000e+00> : vector<8x16xf32>
    %244 = tpu.matmul %24, %243, %cst_80 {dimension_numbers = #tpu.dot_dimension_numbers<[1], [1], [0], [0], [0, 0, 1, 0], [], []>} : vector<8x8xf32>, vector<16x8xf32>, vector<8x16xf32> -> vector<8x16xf32>
    %cst_81 = arith.constant dense<0xFF800000> : vector<8xf32>
    %245 = vector.multi_reduction <maximumf>, %244, %cst_81 [1] : vector<8x16xf32> to vector<8xf32>
    %246 = vector.shape_cast %245 : vector<8xf32> to vector<8x1xf32>
    %247 = vector.broadcast %246 : vector<8x1xf32> to vector<8x16xf32>
    %248 = arith.subf %244, %247 : vector<8x16xf32>
    %249 = math.exp %248 : vector<8x16xf32>
    %cst_82 = arith.constant dense<0.000000e+00> : vector<8xf32>
    %250 = vector.multi_reduction <add>, %249, %cst_82 [1] : vector<8x16xf32> to vector<8xf32>
    %251 = vector.shape_cast %250 : vector<8xf32> to vector<8x1xf32>
    %252 = tpu.reciprocal %251 : vector<8x1xf32> -> vector<8x1xf32>
    %253 = vector.broadcast %252 : vector<8x1xf32> to vector<8x16xf32>
    %254 = arith.mulf %249, %253 : vector<8x16xf32>
    %cst_83 = arith.constant dense<0.000000e+00> : vector<8x8xf32>
    %255 = tpu.matmul %254, %243, %cst_83 {dimension_numbers = #tpu.dot_dimension_numbers<[1], [0], [0], [1], [0, 0, 1, 1], [], []>} : vector<8x16xf32>, vector<16x8xf32>, vector<8x8xf32> -> vector<8x8xf32>
    %cst_84 = arith.constant dense<0.000000e+00> : vector<8x32xf32>
    %256 = tpu.matmul %255, %28, %cst_84 {dimension_numbers = #tpu.dot_dimension_numbers<[1], [0], [0], [1], [0, 0, 1, 1], [], []>} : vector<8x8xf32>, vector<8x32xf32>, vector<8x32xf32> -> vector<8x32xf32>
    %257 = arith.addf %242, %256 : vector<8x32xf32>
    %cst_85 = arith.constant dense<0.000000e+00> : vector<8xf32>
    %258 = vector.multi_reduction <add>, %257, %cst_85 [1] : vector<8x32xf32> to vector<8xf32>
    %259 = vector.shape_cast %258 : vector<8xf32> to vector<8x1xf32>
    %cst_86 = arith.constant 3.200000e+01 : f32
    %260 = vector.broadcast %cst_86 : f32 to vector<8x1xf32>
    %261 = arith.divf %259, %260 : vector<8x1xf32>
    %262 = vector.broadcast %261 : vector<8x1xf32> to vector<8x32xf32>
    %263 = arith.subf %257, %262 : vector<8x32xf32>
    %264 = arith.mulf %263, %263 : vector<8x32xf32>
    %cst_87 = arith.constant dense<0.000000e+00> : vector<8xf32>
    %265 = vector.multi_reduction <add>, %264, %cst_87 [1] : vector<8x32xf32> to vector<8xf32>
    %266 = vector.shape_cast %265 : vector<8xf32> to vector<8x1xf32>
    %cst_88 = arith.constant 3.200000e+01 : f32
    %267 = vector.broadcast %cst_88 : f32 to vector<8x1xf32>
    %268 = arith.divf %266, %267 : vector<8x1xf32>
    %269 = vector.broadcast %261 : vector<8x1xf32> to vector<8x32xf32>
    %270 = arith.subf %257, %269 : vector<8x32xf32>
    %cst_89 = arith.constant 9.99999974E-6 : f32
    %271 = vector.broadcast %cst_89 : f32 to vector<8x1xf32>
    %272 = arith.addf %268, %271 : vector<8x1xf32>
    %273 = math.rsqrt %272 : vector<8x1xf32>
    %274 = vector.broadcast %273 : vector<8x1xf32> to vector<8x32xf32>
    %275 = arith.mulf %270, %274 : vector<8x32xf32>
    %276 = vector.broadcast %7 : vector<1x32xf32> to vector<8x32xf32>
    %277 = arith.mulf %275, %276 : vector<8x32xf32>
    %278 = vector.broadcast %8 : vector<1x32xf32> to vector<8x32xf32>
    %279 = arith.addf %277, %278 : vector<8x32xf32>
    %280 = vector.extract_strided_slice %12 {offsets = [48, 0], sizes = [16, 32], strides = [1, 1]} : vector<64x32xf32> to vector<16x32xf32>
    %281 = vector.extract_strided_slice %280 {offsets = [0, 0], sizes = [16, 8], strides = [1, 1]} : vector<16x32xf32> to vector<16x8xf32>
    %cst_90 = arith.constant dense<0.000000e+00> : vector<8x16xf32>
    %282 = tpu.matmul %15, %281, %cst_90 {dimension_numbers = #tpu.dot_dimension_numbers<[1], [1], [0], [0], [0, 0, 1, 0], [], []>} : vector<8x8xf32>, vector<16x8xf32>, vector<8x16xf32> -> vector<8x16xf32>
    %cst_91 = arith.constant dense<0xFF800000> : vector<8xf32>
    %283 = vector.multi_reduction <maximumf>, %282, %cst_91 [1] : vector<8x16xf32> to vector<8xf32>
    %284 = vector.shape_cast %283 : vector<8xf32> to vector<8x1xf32>
    %285 = vector.broadcast %284 : vector<8x1xf32> to vector<8x16xf32>
    %286 = arith.subf %282, %285 : vector<8x16xf32>
    %287 = math.exp %286 : vector<8x16xf32>
    %cst_92 = arith.constant dense<0.000000e+00> : vector<8xf32>
    %288 = vector.multi_reduction <add>, %287, %cst_92 [1] : vector<8x16xf32> to vector<8xf32>
    %289 = vector.shape_cast %288 : vector<8xf32> to vector<8x1xf32>
    %290 = tpu.reciprocal %289 : vector<8x1xf32> -> vector<8x1xf32>
    %291 = vector.broadcast %290 : vector<8x1xf32> to vector<8x16xf32>
    %292 = arith.mulf %287, %291 : vector<8x16xf32>
    %cst_93 = arith.constant dense<0.000000e+00> : vector<8x8xf32>
    %293 = tpu.matmul %292, %281, %cst_93 {dimension_numbers = #tpu.dot_dimension_numbers<[1], [0], [0], [1], [0, 0, 1, 1], [], []>} : vector<8x16xf32>, vector<16x8xf32>, vector<8x8xf32> -> vector<8x8xf32>
    %cst_94 = arith.constant dense<0.000000e+00> : vector<8x32xf32>
    %294 = tpu.matmul %293, %25, %cst_94 {dimension_numbers = #tpu.dot_dimension_numbers<[1], [0], [0], [1], [0, 0, 1, 1], [], []>} : vector<8x8xf32>, vector<8x32xf32>, vector<8x32xf32> -> vector<8x32xf32>
    %295 = arith.addf %30, %294 : vector<8x32xf32>
    %296 = vector.extract_strided_slice %280 {offsets = [0, 8], sizes = [16, 8], strides = [1, 1]} : vector<16x32xf32> to vector<16x8xf32>
    %cst_95 = arith.constant dense<0.000000e+00> : vector<8x16xf32>
    %297 = tpu.matmul %18, %296, %cst_95 {dimension_numbers = #tpu.dot_dimension_numbers<[1], [1], [0], [0], [0, 0, 1, 0], [], []>} : vector<8x8xf32>, vector<16x8xf32>, vector<8x16xf32> -> vector<8x16xf32>
    %cst_96 = arith.constant dense<0xFF800000> : vector<8xf32>
    %298 = vector.multi_reduction <maximumf>, %297, %cst_96 [1] : vector<8x16xf32> to vector<8xf32>
    %299 = vector.shape_cast %298 : vector<8xf32> to vector<8x1xf32>
    %300 = vector.broadcast %299 : vector<8x1xf32> to vector<8x16xf32>
    %301 = arith.subf %297, %300 : vector<8x16xf32>
    %302 = math.exp %301 : vector<8x16xf32>
    %cst_97 = arith.constant dense<0.000000e+00> : vector<8xf32>
    %303 = vector.multi_reduction <add>, %302, %cst_97 [1] : vector<8x16xf32> to vector<8xf32>
    %304 = vector.shape_cast %303 : vector<8xf32> to vector<8x1xf32>
    %305 = tpu.reciprocal %304 : vector<8x1xf32> -> vector<8x1xf32>
    %306 = vector.broadcast %305 : vector<8x1xf32> to vector<8x16xf32>
    %307 = arith.mulf %302, %306 : vector<8x16xf32>
    %cst_98 = arith.constant dense<0.000000e+00> : vector<8x8xf32>
    %308 = tpu.matmul %307, %296, %cst_98 {dimension_numbers = #tpu.dot_dimension_numbers<[1], [0], [0], [1], [0, 0, 1, 1], [], []>} : vector<8x16xf32>, vector<16x8xf32>, vector<8x8xf32> -> vector<8x8xf32>
    %cst_99 = arith.constant dense<0.000000e+00> : vector<8x32xf32>
    %309 = tpu.matmul %308, %26, %cst_99 {dimension_numbers = #tpu.dot_dimension_numbers<[1], [0], [0], [1], [0, 0, 1, 1], [], []>} : vector<8x8xf32>, vector<8x32xf32>, vector<8x32xf32> -> vector<8x32xf32>
    %310 = arith.addf %295, %309 : vector<8x32xf32>
    %311 = vector.extract_strided_slice %280 {offsets = [0, 16], sizes = [16, 8], strides = [1, 1]} : vector<16x32xf32> to vector<16x8xf32>
    %cst_100 = arith.constant dense<0.000000e+00> : vector<8x16xf32>
    %312 = tpu.matmul %21, %311, %cst_100 {dimension_numbers = #tpu.dot_dimension_numbers<[1], [1], [0], [0], [0, 0, 1, 0], [], []>} : vector<8x8xf32>, vector<16x8xf32>, vector<8x16xf32> -> vector<8x16xf32>
    %cst_101 = arith.constant dense<0xFF800000> : vector<8xf32>
    %313 = vector.multi_reduction <maximumf>, %312, %cst_101 [1] : vector<8x16xf32> to vector<8xf32>
    %314 = vector.shape_cast %313 : vector<8xf32> to vector<8x1xf32>
    %315 = vector.broadcast %314 : vector<8x1xf32> to vector<8x16xf32>
    %316 = arith.subf %312, %315 : vector<8x16xf32>
    %317 = math.exp %316 : vector<8x16xf32>
    %cst_102 = arith.constant dense<0.000000e+00> : vector<8xf32>
    %318 = vector.multi_reduction <add>, %317, %cst_102 [1] : vector<8x16xf32> to vector<8xf32>
    %319 = vector.shape_cast %318 : vector<8xf32> to vector<8x1xf32>
    %320 = tpu.reciprocal %319 : vector<8x1xf32> -> vector<8x1xf32>
    %321 = vector.broadcast %320 : vector<8x1xf32> to vector<8x16xf32>
    %322 = arith.mulf %317, %321 : vector<8x16xf32>
    %cst_103 = arith.constant dense<0.000000e+00> : vector<8x8xf32>
    %323 = tpu.matmul %322, %311, %cst_103 {dimension_numbers = #tpu.dot_dimension_numbers<[1], [0], [0], [1], [0, 0, 1, 1], [], []>} : vector<8x16xf32>, vector<16x8xf32>, vector<8x8xf32> -> vector<8x8xf32>
    %cst_104 = arith.constant dense<0.000000e+00> : vector<8x32xf32>
    %324 = tpu.matmul %323, %27, %cst_104 {dimension_numbers = #tpu.dot_dimension_numbers<[1], [0], [0], [1], [0, 0, 1, 1], [], []>} : vector<8x8xf32>, vector<8x32xf32>, vector<8x32xf32> -> vector<8x32xf32>
    %325 = arith.addf %310, %324 : vector<8x32xf32>
    %326 = vector.extract_strided_slice %280 {offsets = [0, 24], sizes = [16, 8], strides = [1, 1]} : vector<16x32xf32> to vector<16x8xf32>
    %cst_105 = arith.constant dense<0.000000e+00> : vector<8x16xf32>
    %327 = tpu.matmul %24, %326, %cst_105 {dimension_numbers = #tpu.dot_dimension_numbers<[1], [1], [0], [0], [0, 0, 1, 0], [], []>} : vector<8x8xf32>, vector<16x8xf32>, vector<8x16xf32> -> vector<8x16xf32>
    %cst_106 = arith.constant dense<0xFF800000> : vector<8xf32>
    %328 = vector.multi_reduction <maximumf>, %327, %cst_106 [1] : vector<8x16xf32> to vector<8xf32>
    %329 = vector.shape_cast %328 : vector<8xf32> to vector<8x1xf32>
    %330 = vector.broadcast %329 : vector<8x1xf32> to vector<8x16xf32>
    %331 = arith.subf %327, %330 : vector<8x16xf32>
    %332 = math.exp %331 : vector<8x16xf32>
    %cst_107 = arith.constant dense<0.000000e+00> : vector<8xf32>
    %333 = vector.multi_reduction <add>, %332, %cst_107 [1] : vector<8x16xf32> to vector<8xf32>
    %334 = vector.shape_cast %333 : vector<8xf32> to vector<8x1xf32>
    %335 = tpu.reciprocal %334 : vector<8x1xf32> -> vector<8x1xf32>
    %336 = vector.broadcast %335 : vector<8x1xf32> to vector<8x16xf32>
    %337 = arith.mulf %332, %336 : vector<8x16xf32>
    %cst_108 = arith.constant dense<0.000000e+00> : vector<8x8xf32>
    %338 = tpu.matmul %337, %326, %cst_108 {dimension_numbers = #tpu.dot_dimension_numbers<[1], [0], [0], [1], [0, 0, 1, 1], [], []>} : vector<8x16xf32>, vector<16x8xf32>, vector<8x8xf32> -> vector<8x8xf32>
    %cst_109 = arith.constant dense<0.000000e+00> : vector<8x32xf32>
    %339 = tpu.matmul %338, %28, %cst_109 {dimension_numbers = #tpu.dot_dimension_numbers<[1], [0], [0], [1], [0, 0, 1, 1], [], []>} : vector<8x8xf32>, vector<8x32xf32>, vector<8x32xf32> -> vector<8x32xf32>
    %340 = arith.addf %325, %339 : vector<8x32xf32>
    %cst_110 = arith.constant dense<0.000000e+00> : vector<8xf32>
    %341 = vector.multi_reduction <add>, %340, %cst_110 [1] : vector<8x32xf32> to vector<8xf32>
    %342 = vector.shape_cast %341 : vector<8xf32> to vector<8x1xf32>
    %cst_111 = arith.constant 3.200000e+01 : f32
    %343 = vector.broadcast %cst_111 : f32 to vector<8x1xf32>
    %344 = arith.divf %342, %343 : vector<8x1xf32>
    %345 = vector.broadcast %344 : vector<8x1xf32> to vector<8x32xf32>
    %346 = arith.subf %340, %345 : vector<8x32xf32>
    %347 = arith.mulf %346, %346 : vector<8x32xf32>
    %cst_112 = arith.constant dense<0.000000e+00> : vector<8xf32>
    %348 = vector.multi_reduction <add>, %347, %cst_112 [1] : vector<8x32xf32> to vector<8xf32>
    %349 = vector.shape_cast %348 : vector<8xf32> to vector<8x1xf32>
    %cst_113 = arith.constant 3.200000e+01 : f32
    %350 = vector.broadcast %cst_113 : f32 to vector<8x1xf32>
    %351 = arith.divf %349, %350 : vector<8x1xf32>
    %352 = vector.broadcast %344 : vector<8x1xf32> to vector<8x32xf32>
    %353 = arith.subf %340, %352 : vector<8x32xf32>
    %cst_114 = arith.constant 9.99999974E-6 : f32
    %354 = vector.broadcast %cst_114 : f32 to vector<8x1xf32>
    %355 = arith.addf %351, %354 : vector<8x1xf32>
    %356 = math.rsqrt %355 : vector<8x1xf32>
    %357 = vector.broadcast %356 : vector<8x1xf32> to vector<8x32xf32>
    %358 = arith.mulf %353, %357 : vector<8x32xf32>
    %359 = vector.broadcast %7 : vector<1x32xf32> to vector<8x32xf32>
    %360 = arith.mulf %358, %359 : vector<8x32xf32>
    %361 = vector.broadcast %8 : vector<1x32xf32> to vector<8x32xf32>
    %362 = arith.addf %360, %361 : vector<8x32xf32>
    %363 = tpu.concatenate %113, %196, %279, %362 in 0 : vector<8x32xf32>, vector<8x32xf32>, vector<8x32xf32>, vector<8x32xf32> -> vector<32x32xf32>
    %c0_115 = arith.constant 0 : index
    %c0_116 = arith.constant 0 : index
    %364 = vector.load %arg7[%c0_115, %c0_116] : memref<32x32xf32, #tpu.memory_space<vmem>>, vector<32x32xf32>
    tpu.vector_store %arg7[%c0_115, %c0_116], %363 {strides = array<i32>} : memref<32x32xf32, #tpu.memory_space<vmem>>, vector<32x32xf32>,
    return
  }
  func.func @transform_0(%arg0: i32) -> (i32, i32) {
    %c0_i32 = arith.constant 0 : i32
    %c0_i32_0 = arith.constant 0 : i32
    %c0_i32_1 = arith.constant 0 : i32
    return %c0_i32, %c0_i32_0 : i32, i32
  }
  func.func @transform_1(%arg0: i32) -> (i32, i32) {
    %c0_i32 = arith.constant 0 : i32
    %c0_i32_0 = arith.constant 0 : i32
    %c0_i32_1 = arith.constant 0 : i32
    return %c0_i32, %c0_i32_0 : i32, i32
  }
  func.func @transform_2(%arg0: i32) -> (i32, i32) {
    %c0_i32 = arith.constant 0 : i32
    %c0_i32_0 = arith.constant 0 : i32
    return %arg0, %c0_i32 : i32, i32
  }
  func.func @transform_3(%arg0: i32) -> (i32, i32) {
    %c0_i32 = arith.constant 0 : i32
    %c0_i32_0 = arith.constant 0 : i32
    %c0_i32_1 = arith.constant 0 : i32
    return %c0_i32, %c0_i32_0 : i32, i32
  }
  func.func @transform_4(%arg0: i32) -> (i32, i32) {
    %c0_i32 = arith.constant 0 : i32
    %c0_i32_0 = arith.constant 0 : i32
    %c0_i32_1 = arith.constant 0 : i32
    return %c0_i32, %c0_i32_0 : i32, i32
  }
  func.func @transform_5(%arg0: i32) -> (i32, i32) {
    %c0_i32 = arith.constant 0 : i32
    %c0_i32_0 = arith.constant 0 : i32
    %c0_i32_1 = arith.constant 0 : i32
    return %c0_i32, %c0_i32_0 : i32, i32
  }
  func.func @transform_6(%arg0: i32) -> (i32, i32) {
    %c0_i32 = arith.constant 0 : i32
    %c0_i32_0 = arith.constant 0 : i32
    return %arg0, %c0_i32 : i32, i32
  }
}

</mosaic_0001>

<bundles_post_ra>
// kernel: tpu_custom_call.1
= control target key start
LH: loop header
LB: loop body
LE: loop exit
PB: predicated region body
PF: predicated region fallthrough
CT: control target
= control target key end

     0   :  { %s5259_s21 = smov 0   ;;  %s5759_s0 = inlined_call_operand.vmem [shape: f32[8,32], index: 0, kind: input, shape index: {}]   ;;  %s5760_s1 = inlined_call_operand.vmem [shape: f32[8,32], index: 1, kind: input, shape index: {}]   ;;  %s5761_s2 = inlined_call_operand.vmem [shape: f32[128,32], index: 2, kind: input, shape index: {}]   ;;  %s5762_s3 = inlined_call_operand.vmem [shape: f32[32,32], index: 3, kind: input, shape index: {}]   ;;  %s5763_s4 = inlined_call_operand.vmem [shape: f32[32,32], index: 4, kind: input, shape index: {}]   ;;  %s5764_s5 = inlined_call_operand.vmem [shape: f32[4,32], index: 5, kind: input, shape index: {}]   ;;  %s5765_s6 = inlined_call_operand.vmem [shape: f32[64,32], index: 6, kind: output, shape index: {}]  }
   0x1 LB: > { %s4352_s22 = sadd.s32 4294967295, %s5216_s21   ;;  %p4356_p0 = scmp.ge.s32.totalorder %s5216_s21, 1  ;;  %s5216_s21 = sphi %s5259_s21, %s16_s21  }
   0x2   : > { %p213_p1 = scmp.lt.s32.totalorder %s5216_s21, 3 }
   0x4   : > { %p214_p2 = pnand %p4356_p0, %p213_p1 }
   0x5   : > { %v257_v0 = vld [vmem:[%s5762_s3] sm:$0xff] (!%p214_p2)  ;;  %v258_v1 = vld [vmem:[%s5762_s3 + $0x8] sm:$0xff] (!%p214_p2)  ;;  %v259_v2 = vld [vmem:[%s5762_s3 + $0x10] sm:$0xff] (!%p214_p2)  ;;  %s4357_s29 = sshll.u32 (!%p214_p2), %s4352_s22, 3  ;;  %vm278_vm0 = vcmask (!%p214_p2), 261120   ;;  %v5218_v8 = vmov (!%p214_p2), 0.0|0.0   ;;  %v274_v12 = vlaneseq (!%p214_p2) }
   0x6   : > { %217 = sbr.rel (%p214_p2) target bundleno = 5154 (0x1422), region = 44  ;;  %v4915_v3 = vpack.c.bf16 (!%p214_p2), %v258_v1, %v257_v0  ;;  %v260_v4 = vld [vmem:[%s5762_s3 + $0x18] sm:$0xff] (!%p214_p2)  ;;  %p244_p3 = scmp.lt.s32.totalorder (!%p214_p2), %s4357_s29, 15  ;;  %4923 = vmatprep.subr.bf16.mxu1 (!%p214_p2), %v5218_v8  ;;  %vm5219_vm1 = vmmov (!%p214_p2), 0   ;;  %v5220_v9 = vmov (!%p214_p2), 0.0   ;;  %vm414_vm2 = vcmask (!%p214_p2), 64512  }
   0x7   : > { %v4919_v5 = vpack.c.bf16 (!%p214_p2), %v260_v4, %v259_v2  ;;  %4615 = vmatprep.mubr.msk.f32.mxu1 (!%p214_p2), %vm5219_vm1, %v5220_v9  ;;  %v5292_v13 = vshrl.u32 (!%p214_p2), %v274_v12, 7  ;;  %v265_v16 = vld [vmem:[%s5764_s5] sm:$0xf] (!%p214_p2)  ;;  %vm5310_vm3 = vmpackc.low (!%p214_p2), %vm414_vm2, %vm414_vm2  ;;  %s5221_s16 = smov (!%p214_p2), 120   ;;  %s5222_s17 = smov (!%p214_p2), 112   ;;  %vm494_vm4 = vcmask (!%p214_p2), 130048  }
   0x8   : > { %4916 = vmatprep.subr.bf16.mxu0 (!%p214_p2), %v4915_v3  ;;  %v255_v26 = vld [vmem:[%s5759_s0] sm:$0xff] (!%p214_p2)  ;;  %s5223_s18 = smov (!%p214_p2), 104   ;;  %s4359_s9 = sshll.u32 (!%p214_p2), %s4352_s22, 2 }
   0x9   : > { %4918 = vmatpush3.bf16.msra.mxu0 (!%p214_p2), %v4915_v3  ;;  %v276_v14 = vsub.s32 (!%p214_p2), 0, %v5292_v13  ;;  %v5320_v29 = vmul.f32 (!%p214_p2), 0.35355338, %v255_v26  ;;  %p250_p4 = scmp.lt.s32.totalorder (!%p214_p2), %s4359_s9, 7 }
   0xa   : > { %4920 = vmatprep.subr.bf16.mxu0 (!%p214_p2), %v4919_v5 }
   0xb   : > { %v5300_v18 = vrot.slane (!%p214_p2), %v265_v16, %v276_v14  ;;  %v5392_v16 = vld [vmem:[%s5763_s4] sm:$0xff] (!%p214_p2) }
   0xd   : > { %s5769_s29 = smov (!%p244_p3, %s4357_s29), 15  ;;  %4922 = vmatpush3.bf16.msra.mxu0 %v4919_v5  ;;  %s5771_s9 = smov (!%p250_p4, %s4359_s9), 7 }
   0xe   : > { %s4358_s8 = sshll.u32 %s5769_s29, 3  ;;  %4930 = vmatprep.subr.bf16.mxu0 %v5218_v8  ;;  %s4360_s10 = sshll.u32 %s5771_s9, 3 }
   0xf   : > { %s247_s11 = scalar_lea.vmem %s5761_s2, %s4358_s8  ;;  %s253_s12 = scalar_lea.vmem %s5765_s6, %s4360_s10 }
  0x10   : > { %v266_v6 = vld [vmem:[%s247_s11] sm:$0xff]  ;;  %v267_v7 = vld [vmem:[%s247_s11 + $0x8] sm:$0xff]  ;;  %v268_v10 = vld [vmem:[%s247_s11 + $0x10] sm:$0xff] }
  0x11   : > { %4599 = vmatprep.mubr.msk.f32.mxu0 %vm278_vm0, %v266_v6  ;;  %v269_v11 = vld [vmem:[%s247_s11 + $0x18] sm:$0xff]  ;;  %v270_v15 = vld [vmem:[%s247_s11 + $0x20] sm:$0xff]  ;;  %v271_v17 = vld [vmem:[%s247_s11 + $0x28] sm:$0xff] }
  0x12   : > { %4600 = vmatmul.mubr.msk.f32.vlgmr.msra.gmra.mrb[0].mxu0 %vm278_vm0, %v267_v7  ;;  %v272_v19 = vld [vmem:[%s247_s11 + $0x30] sm:$0xff]  ;;  %v273_v20 = vld [vmem:[%s247_s11 + $0x38] sm:$0xff] }
  0x13   : > { %4602 = vmatprep.mubr.msk.f32.mxu0 %vm278_vm0, %v268_v10 }
  0x16   : > { %4603 = vmatmul.mubr.msk.f32.gmra.mrb[2].mxu0 %vm278_vm0, %v269_v11 }
  0x17   : > { %4605 = vmatprep.mubr.msk.f32.mxu0 %vm278_vm0, %v270_v15 }
  0x1a   : > { %4606 = vmatmul.mubr.msk.f32.gmra.mrb[4].mxu0 %vm278_vm0, %v271_v17 }
  0x1b   : > { %4608 = vmatprep.mubr.msk.f32.mxu0 %vm278_vm0, %v272_v19 }
  0x1e   : > { %4609 = vmatmul.mubr.msk.f32.gmra.mrb[6].mxu0 %vm278_vm0, %v273_v20 }
  0x1f   : > { %4634 = vmatprep.mubr.msk.f32.mxu0 %vm5219_vm1, %v5220_v9 }
  0xe5   : > { %v4601_v21 = vpop.f32.mrb[0].mxu0 }
  0xe6   : > { %v375_v22 = vadd.f32 %v4601_v21, %v5300_v18  ;;  %v369_v23 = vpop.f32.mrb[1].mxu0 }
  0xe7   : > { %v370_v24 = vadd.f32 %v369_v23, %v5300_v18 }
  0xe9   : > { %v5077_v27 = vpack.i.bf16 %v375_v22, %v370_v24  ;;  %v4924_v28 = vpack.c.bf16 %v375_v22, %v370_v24  ;;  %v5331_v30 = vpop.f32.mrb[2].mxu0 }
  0xea   : > { %v5333_v31 = vpop.f32.mrb[3].mxu0  ;;  %v385_v17 = vadd.f32 %v5331_v30, %v5300_v18 }
  0xeb   : > { %5078 = vrot.lane.b32.xlu0 %v5077_v27, %s5221_s16  ;;  %4926 = vmatpush3.bf16.xpose.msk.msra.mxu1 %vm5310_vm3, %v4924_v28  ;;  %v380_v19 = vadd.f32 %v5333_v31, %v5300_v18  ;;  %v5428_v31 = vld [vmem:[%s5763_s4 + $0x8] sm:$0xff] }
  0xec   : > { %4927 = vmatprep.subr.bf16.mxu1 %v5218_v8 }
  0xed   : > { %v4607_v41 = vpop.f32.mrb[4].mxu0  ;;  %v5400_v21 = vpack.c.bf16 %v385_v17, %v380_v19 }
  0xee   : > { %v395_v42 = vadd.f32 %v4607_v41, %v5300_v18  ;;  %v389_v43 = vpop.f32.mrb[5].mxu0 }
  0xef   : > { %653 = vrot.lane.b32.xlu0 %v5320_v29, %s5221_s16  ;;  %v390_v44 = vadd.f32 %v389_v43, %v5300_v18 }
  0xf1   : > { %v5355_v45 = vpack.c.bf16 %v395_v42, %v390_v44  ;;  %v4610_v46 = vpop.f32.mrb[6].mxu0  ;;  %v5358_v49 = vpack.i.bf16 %v395_v42, %v390_v44 }
  0xf2   : > { %4616 = vmatmul.mubr.msk.f32.vlgmr.msra.gmra.mrb[0].mxu1 %vm414_vm2, %v5320_v29  ;;  %v405_v47 = vadd.f32 %v4610_v46, %v5300_v18  ;;  %v399_v48 = vpop.f32.mrb[7].mxu0 }
  0xf3   : > { %5083 = vrot.lane.b32.xlu0 %v5077_v27, %s5222_s17  ;;  %4929 = vmatpush3.bf16.msra.mxu1 %v4924_v28  ;;  %v400_v50 = vadd.f32 %v399_v48, %v5300_v18 }
  0xf4   : > { %4622 = vmatprep.mubr.msk.f32.mxu1 %vm5219_vm1, %v5220_v9  ;;  %4625 = vmatprep.subr.mxu1 %v5220_v9 }
  0xf5   : > { %v5361_v51 = vpack.c.bf16 %v405_v47, %v400_v50  ;;  %v5363_v52 = vpack.i.bf16 %v405_v47, %v400_v50 }
 0x15d   : > { %v5079_v32 = vpop.permute.xlu0 %5078 }
 0x15e   : > { %v5081_v33 = vunpack.i.h.bf16 %v5079_v32  ;;  %v5080_v34 = vunpack.i.l.bf16 %v5079_v32 }
 0x160   : > { %v5335_v35 = vpack.c.bf16 %v5081_v33, %v5080_v34 }
 0x161   : > { %v5337_v36 = vpop.permute.xlu0 %653 }
 0x162   : > { %4933 = vmatpush3.bf16.xpose.msk.msra.mxu0 %vm5310_vm3, %v5335_v35 }
 0x163   : > { %4937 = vmatprep.subr.bf16.mxu0 %v5218_v8 }
 0x165   : > { %v5084_v37 = vpop.permute.xlu0 %5083 }
 0x166   : > { %v5086_v38 = vunpack.i.h.bf16 %v5084_v37  ;;  %v5085_v39 = vunpack.i.l.bf16 %v5084_v37 }
 0x168   : > { %v5343_v40 = vpack.c.bf16 %v5086_v38, %v5085_v39 }
 0x169   : > { %4635 = vmatmul.mubr.msk.f32.vlgmr.msra.gmra.mrb[8].mxu0 %vm414_vm2, %v5337_v36 }
 0x16a   : > { %4940 = vmatpush3.bf16.xpose.msk.msra.mxu0 %vm5310_vm3, %v5343_v40  ;;  %4653 = vmatprep.mubr.msk.f32.mxu0 %vm5219_vm1, %v5220_v9 }
 0x16b   : > { %4944 = vmatprep.subr.bf16.mxu0 %v5218_v8 }
 0x1c5   : > { %v490_v53 = vpop.f32.mrb[0].mxu1 }
 0x1c6   : > { %v495_v54 = vsel %vm494_vm4, %v490_v53, -inf  ;;  %v4617_v55 = vpop.f32.mrb[1].mxu1 }
 0x1c7   : > { %496 = vmax.xlane.f32.xlu1 %v495_v54 }
 0x23c   : > { %v731_v56 = vpop.f32.mrb[8].mxu0 }
 0x23d   : > { %v735_v57 = vsel %vm494_vm4, %v731_v56, -inf  ;;  %v4636_v58 = vpop.f32.mrb[9].mxu0 }
 0x23e   : > { %736 = vmax.xlane.f32.xlu0 %v735_v57 }
 0x254   : > { %5088 = vrot.lane.b32.xlu0 %v5077_v27, %s5223_s18  ;;  %v497_v59 = vpop.xlane.xlu1 %496 }
 0x255   : > { %v498_v60 = vsub.f32 %v490_v53, %v497_v59 }
 0x257   : > { %v499_v61 = vmul.f32 1.442695, %v498_v60 }
 0x259   : > { %5137 = vpow2.f32 %v499_v61 }
 0x263   : > { %v5138_v62 = vpop.eup %5137 }
 0x264   : > { %v501_v63 = vsel %vm494_vm4, %v5138_v62, 0.0 }
 0x265   : > { %502 = vadd.xlane.f32.xlu1 %v501_v63 }
 0x276   : > { %895 = vrot.lane.b32.xlu1 %v5320_v29, %s5222_s17 }
 0x2cb   : > { %v737_v0 = vpop.xlane.xlu0 %736 }
 0x2cc   : > { %v738_v1 = vsub.f32 %v731_v56, %v737_v0  ;;  %v5092_v56 = vpack.i.bf16 %v385_v17, %v380_v19  ;;  %v5450_v0 = vld [vmem:[%s5763_s4 + $0x10] sm:$0xff] }
 0x2ce   : > { %v739_v2 = vmul.f32 1.442695, %v738_v1 }
 0x2cf   : > { %v5089_v5 = vpop.permute.xlu0 %5088 }
 0x2d0   : > { %5139 = vpow2.f32 %v739_v2  ;;  %v5091_v6 = vunpack.i.h.bf16 %v5089_v5  ;;  %v5090_v7 = vunpack.i.l.bf16 %v5089_v5 }
 0x2d2   : > { %v5374_v11 = vpack.c.bf16 %v5091_v6, %v5090_v7 }
 0x2da   : > { %v5140_v3 = vpop.eup %5139 }
 0x2db   : > { %v741_v4 = vsel %vm494_vm4, %v5140_v3, 0.0 }
 0x2dc   : > { %742 = vadd.xlane.f32.xlu1 %v741_v4 }
 0x2ed   : > { %1137 = vrot.lane.b32.xlu1 %v5320_v29, %s5223_s18 }
 0x2f2   : > { %v503_v10 = vpop.xlane.xlu1 %502 }
 0x2f3   : > { %5141 = vrcp.f32 %v503_v10 }
 0x2f6   : > { %v5376_v12 = vpop.permute.xlu1 %895 }
 0x2f7   : > { %4654 = vmatmul.mubr.msk.f32.vlgmr.msra.gmra.mrb[10].mxu0 %vm414_vm2, %v5376_v12 }
 0x2f8   : > { %4947 = vmatpush3.bf16.xpose.msk.msra.mxu0 %vm5310_vm3, %v5374_v11  ;;  %4672 = vmatprep.mubr.msk.f32.mxu0 %vm5219_vm1, %v5220_v9 }
 0x2f9   : > { %4951 = vmatprep.subr.bf16.mxu0 %v5218_v8 }
 0x2fd   : > { %v5142_v14 = vpop.eup %5141 }
 0x2fe   : > { %v505_v15 = vmul.f32 %v5142_v14, %v5138_v62 }
 0x300   : > { %4623 = vmatmul.mubr.msk.f32.vlgmr.msra.gmra.mrb[2].mxu1 %vm494_vm4, %v505_v15 }
 0x301   : > { %4627 = vmatprep.mubr.msk.f32.mxu1 %vm5219_vm1, %v5220_v9  ;;  %4626 = vmatpush3.msra.mxu1 %v5392_v16 }
 0x302   : > { %4934 = vmatprep.subr.bf16.mxu1 %v5218_v8 }
 0x369   : > { %v743_v20 = vpop.xlane.xlu1 %742 }
 0x36a   : > { %5143 = vrcp.f32 %v743_v20 }
 0x36d   : > { %v5402_v22 = vpop.permute.xlu1 %1137 }
 0x36e   : > { %4673 = vmatmul.mubr.msk.f32.vlgmr.msra.gmra.mrb[12].mxu0 %vm414_vm2, %v5402_v22 }
 0x36f   : > { %4954 = vmatpush3.bf16.xpose.msk.msra.mxu0 %vm5310_vm3, %v5400_v21  ;;  %4691 = vmatprep.mubr.msk.f32.mxu0 %vm5219_vm1, %v5220_v9 }
 0x370   : > { %4958 = vmatprep.subr.bf16.mxu0 %v5218_v8 }
 0x374   : > { %v5144_v26 = vpop.eup %5143 }
 0x375   : > { %v745_v30 = vmul.f32 %v5144_v26, %v5140_v3 }
 0x376   : > { %4692 = vmatmul.mubr.msk.f32.vlgmr.msra.gmra.mrb[14].mxu0 %vm414_vm2, %v5320_v29 }
 0x377   : > { %4710 = vmatprep.mubr.msk.f32.mxu0 %vm5219_vm1, %v5220_v9 }
 0x3ca   : > { %v973_v18 = vpop.f32.mrb[10].mxu0 }
 0x3cb   : > { %v977_v23 = vsel %vm494_vm4, %v973_v18, -inf  ;;  %v4655_v24 = vpop.f32.mrb[11].mxu0 }
 0x3cc   : > { %978 = vmax.xlane.f32.xlu0 %v977_v23  ;;  %v5485_v23 = vld [vmem:[%s5763_s4 + $0x18] sm:$0xff] }
 0x3d3   : > { %v575_v27 = vpop.f32.mrb[2].mxu1 }
 0x3d4   : > { %v4624_v28 = vpop.f32.mrb[3].mxu1  ;;  %4628 = vmatmul.mubr.msk.f32.vlgmr.msra.gmra.mrb[4].mxu1 %vm414_vm2, %v575_v27 }
 0x3d5   : > { %4936 = vmatpush3.bf16.msra.mxu1 %v5335_v35  ;;  %4641 = vmatprep.mubr.msk.f32.mxu1 %vm5219_vm1, %v5220_v9 }
 0x3d6   : > { %4644 = vmatprep.subr.mxu1 %v5220_v9 }
 0x3d8   : > { %4642 = vmatmul.mubr.msk.f32.vlgmr.msra.gmra.mrb[6].mxu1 %vm494_vm4, %v745_v30 }
 0x3d9   : > { %4646 = vmatprep.mubr.msk.f32.mxu1 %vm5219_vm1, %v5220_v9  ;;  %4645 = vmatpush3.msra.mxu1 %v5428_v31 }
 0x3da   : > { %4941 = vmatprep.subr.bf16.mxu1 %v5218_v8 }
 0x441   : > { %v1215_v32 = vpop.f32.mrb[12].mxu0 }
 0x442   : > { %v1219_v33 = vsel %vm494_vm4, %v1215_v32, -inf  ;;  %v4674_v34 = vpop.f32.mrb[13].mxu0 }
 0x443   : > { %1220 = vmax.xlane.f32.xlu0 %v1219_v33 }
 0x449   : > { %v1475_v35 = vpop.f32.mrb[14].mxu0 }
 0x44a   : > { %v4693_v37 = vpop.f32.mrb[15].mxu0  ;;  %v1479_v44 = vsel %vm494_vm4, %v1475_v35, -inf }
 0x459   : > { %v979_v38 = vpop.xlane.xlu0 %978 }
 0x45a   : > { %v980_v39 = vsub.f32 %v973_v18, %v979_v38 }
 0x45c   : > { %v981_v41 = vmul.f32 1.442695, %v980_v39 }
 0x45e   : > { %5145 = vpow2.f32 %v981_v41 }
 0x468   : > { %v5146_v42 = vpop.eup %5145 }
 0x469   : > { %v983_v43 = vsel %vm494_vm4, %v5146_v42, 0.0 }
 0x46a   : > { %984 = vadd.xlane.f32.xlu1 %v983_v43 }
 0x46e   : > { %1480 = vmax.xlane.f32.xlu1 %v1479_v44 }
 0x4ab   : > { %v817_v46 = vpop.f32.mrb[6].mxu1 }
 0x4ac   : > { %v4643_v47 = vpop.f32.mrb[7].mxu1  ;;  %4647 = vmatmul.mubr.msk.f32.vlgmr.msra.gmra.mrb[4].mxu1 %vm414_vm2, %v817_v46 }
 0x4ad   : > { %4943 = vmatpush3.bf16.msra.mxu1 %v5343_v40  ;;  %4660 = vmatprep.mubr.msk.f32.mxu1 %vm5219_vm1, %v5220_v9 }
 0x4ae   : > { %4663 = vmatprep.subr.mxu1 %v5220_v9 }
 0x4d0   : > { %v1221_v48 = vpop.xlane.xlu0 %1220 }
 0x4d1   : > { %v1222_v50 = vsub.f32 %v1215_v32, %v1221_v48 }
 0x4d3   : > { %v1223_v53 = vmul.f32 1.442695, %v1222_v50 }
 0x4d5   : > { %5147 = vpow2.f32 %v1223_v53 }
 0x4df   : > { %v5148_v54 = vpop.eup %5147 }
 0x4e0   : > { %v1225_v55 = vsel %vm494_vm4, %v5148_v54, 0.0 }
 0x4e1   : > { %1226 = vadd.xlane.f32.xlu0 %v1225_v55 }
 0x4f7   : > { %5093 = vrot.lane.b32.xlu0 %v5092_v56, %s5221_s16  ;;  %v985_v57 = vpop.xlane.xlu1 %984 }
 0x4f8   : > { %5149 = vrcp.f32 %v985_v57 }
 0x4fb   : > { %v1481_v58 = vpop.xlane.xlu1 %1480 }
 0x4fc   : > { %v1482_v40 = vsub.f32 %v1475_v35, %v1481_v58 }
 0x4fe   : > { %v1483_v59 = vmul.f32 1.442695, %v1482_v40 }
 0x500   : > { %5151 = vpow2.f32 %v1483_v59 }
 0x502   : > { %v5150_v60 = vpop.eup %5149 }
 0x503   : > { %v987_v61 = vmul.f32 %v5150_v60, %v5146_v42 }
 0x505   : > { %4661 = vmatmul.mubr.msk.f32.vlgmr.msra.gmra.mrb[8].mxu1 %vm494_vm4, %v987_v61 }
 0x506   : > { %4665 = vmatprep.mubr.msk.f32.mxu1 %vm5219_vm1, %v5220_v9  ;;  %4664 = vmatpush3.msra.mxu1 %v5450_v0 }
 0x507   : > { %4948 = vmatprep.subr.bf16.mxu1 %v5218_v8 }
 0x50a   : > { %v5152_v62 = vpop.eup %5151 }
 0x50b   : > { %v1485_v63 = vsel %vm494_vm4, %v5152_v62, 0.0 }
 0x50c   : > { %1486 = vadd.xlane.f32.xlu1 %v1485_v63 }
 0x51d   : > { %5098 = vrot.lane.b32.xlu1 %v5092_v56, %s5222_s17 }
 0x56e   : > { %v1227_v1 = vpop.xlane.xlu0 %1226 }
 0x56f   : > { %5153 = vrcp.f32 %v1227_v1 }
 0x572   : > { %v5094_v2 = vpop.permute.xlu0 %5093 }
 0x573   : > { %v5096_v3 = vunpack.i.h.bf16 %v5094_v2  ;;  %v5095_v4 = vunpack.i.l.bf16 %v5094_v2 }
 0x575   : > { %v5454_v5 = vpack.c.bf16 %v5096_v3, %v5095_v4 }
 0x577   : > { %4961 = vmatpush3.bf16.xpose.msk.msra.mxu0 %vm5310_vm3, %v5454_v5 }
 0x578   : > { %4965 = vmatprep.subr.bf16.mxu0 %v5218_v8 }
 0x579   : > { %v5154_v17 = vpop.eup %5153 }
 0x57a   : > { %v1229_v18 = vmul.f32 %v5154_v17, %v5148_v54 }
 0x57e   : > { %4711 = vmatmul.mubr.msk.f32.vlgmr.msra.gmra.mrb[16].mxu0 %vm414_vm2, %v5337_v36 }
 0x57f   : > { %4729 = vmatprep.mubr.msk.f32.mxu0 %vm5219_vm1, %v5220_v9 }
 0x599   : > { %v1487_v6 = vpop.xlane.xlu1 %1486 }
 0x59a   : > { %5155 = vrcp.f32 %v1487_v6 }
 0x59d   : > { %v5099_v7 = vpop.permute.xlu1 %5098 }
 0x59e   : > { %v5101_v10 = vunpack.i.h.bf16 %v5099_v7  ;;  %v5100_v14 = vunpack.i.l.bf16 %v5099_v7 }
 0x5a0   : > { %v5464_v15 = vpack.c.bf16 %v5101_v10, %v5100_v14 }
 0x5a2   : > { %4968 = vmatpush3.bf16.xpose.msk.msra.mxu0 %vm5310_vm3, %v5464_v15 }
 0x5a3   : > { %4972 = vmatprep.subr.bf16.mxu0 %v5218_v8 }
 0x5a4   : > { %v5156_v30 = vpop.eup %5155 }
 0x5a5   : > { %v1489_v34 = vmul.f32 %v5156_v30, %v5152_v62 }
 0x5a9   : > { %4730 = vmatmul.mubr.msk.f32.vlgmr.msra.gmra.mrb[18].mxu0 %vm414_vm2, %v5376_v12 }
 0x5aa   : > { %4748 = vmatprep.mubr.msk.f32.mxu0 %vm5219_vm1, %v5220_v9 }
 0x5d8   : > { %v1059_v19 = vpop.f32.mrb[8].mxu1 }
 0x5d9   : > { %v4662_v20 = vpop.f32.mrb[9].mxu1  ;;  %4666 = vmatmul.mubr.msk.f32.vlgmr.msra.gmra.mrb[4].mxu1 %vm414_vm2, %v1059_v19 }
 0x5da   : > { %4950 = vmatpush3.bf16.msra.mxu1 %v5374_v11  ;;  %4679 = vmatprep.mubr.msk.f32.mxu1 %vm5219_vm1, %v5220_v9 }
 0x5db   : > { %4682 = vmatprep.subr.mxu1 %v5220_v9 }
 0x5dd   : > { %4680 = vmatmul.mubr.msk.f32.vlgmr.msra.gmra.mrb[10].mxu1 %vm494_vm4, %v1229_v18 }
 0x5de   : > { %4684 = vmatprep.mubr.msk.f32.mxu1 %vm5219_vm1, %v5220_v9  ;;  %4683 = vmatpush3.msra.mxu1 %v5485_v23 }
 0x5df   : > { %4955 = vmatprep.subr.bf16.mxu1 %v5218_v8 }
 0x651   : > { %v1711_v11 = vpop.f32.mrb[16].mxu0 }
 0x652   : > { %v4712_v24 = vpop.f32.mrb[17].mxu0  ;;  %v1715_v26 = vsel %vm494_vm4, %v1711_v11, -inf }
 0x653   : > { %1716 = vmax.xlane.f32.xlu0 %v1715_v26 }
 0x669   : > { %5103 = vrot.lane.b32.xlu0 %v5092_v56, %s5223_s18 }
 0x67c   : > { %v1949_v27 = vpop.f32.mrb[18].mxu0 }
 0x67d   : > { %v4731_v28 = vpop.f32.mrb[19].mxu0  ;;  %v1953_v46 = vsel %vm494_vm4, %v1949_v27, -inf }
 0x6b0   : > { %v1301_v32 = vpop.f32.mrb[10].mxu1 }
 0x6b1   : > { %v4681_v33 = vpop.f32.mrb[11].mxu1  ;;  %4685 = vmatmul.mubr.msk.f32.vlgmr.msra.gmra.mrb[4].mxu1 %vm414_vm2, %v1301_v32 }
 0x6b2   : > { %4957 = vmatpush3.bf16.msra.mxu1 %v5400_v21  ;;  %4698 = vmatprep.mubr.msk.f32.mxu1 %vm5219_vm1, %v5220_v9 }
 0x6b3   : > { %4701 = vmatprep.subr.mxu1 %v5220_v9 }
 0x6b5   : > { %4699 = vmatmul.mubr.msk.f32.vlgmr.msra.gmra.mrb[12].mxu1 %vm494_vm4, %v1489_v34 }
 0x6b6   : > { %4702 = vmatpush3.msra.mxu1 %v5392_v16  ;;  %4703 = vmatprep.mubr.msk.f32.mxu1 %vm5219_vm1, %v5220_v9 }
 0x6b7   : > { %4962 = vmatprep.subr.bf16.mxu1 %v5218_v8 }
 0x6e0   : > { %v1717_v35 = vpop.xlane.xlu0 %1716 }
 0x6e1   : > { %v1718_v37 = vsub.f32 %v1711_v11, %v1717_v35 }
 0x6e3   : > { %v1719_v38 = vmul.f32 1.442695, %v1718_v37 }
 0x6e4   : > { %v5104_v39 = vpop.permute.xlu0 %5103 }
 0x6e5   : > { %5157 = vpow2.f32 %v1719_v38  ;;  %v5106_v21 = vunpack.i.h.bf16 %v5104_v39  ;;  %v5105_v41 = vunpack.i.l.bf16 %v5104_v39 }
 0x6e7   : > { %v5501_v42 = vpack.c.bf16 %v5106_v21, %v5105_v41 }
 0x6e9   : > { %4975 = vmatpush3.bf16.xpose.msk.msra.mxu0 %vm5310_vm3, %v5501_v42 }
 0x6ea   : > { %4979 = vmatprep.subr.bf16.mxu0 %v5218_v8 }
 0x6ef   : > { %v5158_v43 = vpop.eup %5157 }
 0x6f0   : > { %4749 = vmatmul.mubr.msk.f32.vlgmr.msra.gmra.mrb[20].mxu0 %vm414_vm2, %v5402_v22  ;;  %v1721_v44 = vsel %vm494_vm4, %v5158_v43, 0.0 }
 0x6f1   : > { %1722 = vadd.xlane.f32.xlu1 %v1721_v44  ;;  %4982 = vmatpush3.bf16.xpose.msk.msra.mxu0 %vm5310_vm3, %v5355_v45 }
 0x6f2   : > { %4767 = vmatprep.mubr.msk.f32.mxu0 %vm5219_vm1, %v5220_v9  ;;  %4986 = vmatprep.subr.bf16.mxu0 %v5218_v8 }
 0x6f5   : > { %1954 = vmax.xlane.f32.xlu1 %v1953_v46 }
 0x6f8   : > { %4768 = vmatmul.mubr.msk.f32.vlgmr.msra.gmra.mrb[22].mxu0 %vm414_vm2, %v5320_v29 }
 0x6f9   : > { %4786 = vmatprep.mubr.msk.f32.mxu0 %vm5219_vm1, %v5220_v9 }
 0x77e   : > { %v1723_v47 = vpop.xlane.xlu1 %1722 }
 0x77f   : > { %5159 = vrcp.f32 %v1723_v47 }
 0x782   : > { %v1955_v48 = vpop.xlane.xlu1 %1954 }
 0x783   : > { %v1956_v50 = vsub.f32 %v1949_v27, %v1955_v48 }
 0x784   : > { %v5521_v53 = vpop.f32.mrb[4].mxu1 }
 0x785   : > { %v1957_v54 = vmul.f32 1.442695, %v1956_v50  ;;  %v4686_v55 = vpop.f32.mrb[5].mxu1 }
 0x787   : > { %5161 = vpow2.f32 %v1957_v54 }
 0x788   : > { %v1559_v56 = vpop.f32.mrb[12].mxu1 }
 0x789   : > { %v5160_v57 = vpop.eup %5159  ;;  %v4700_v58 = vpop.f32.mrb[13].mxu1  ;;  %4704 = vmatmul.mubr.msk.f32.vlgmr.msra.gmra.mrb[14].mxu1 %vm414_vm2, %v1559_v56 }
 0x78a   : > { %v1725_v40 = vmul.f32 %v5160_v57, %v5158_v43  ;;  %4964 = vmatpush3.bf16.msra.mxu1 %v5454_v5  ;;  %4717 = vmatprep.mubr.msk.f32.mxu1 %vm5219_vm1, %v5220_v9 }
 0x78b   : > { %4720 = vmatprep.subr.mxu1 %v5220_v9 }
 0x78d   : > { %4718 = vmatmul.mubr.msk.f32.vlgmr.msra.gmra.mrb[16].mxu1 %vm494_vm4, %v1725_v40 }
 0x78e   : > { %4721 = vmatpush3.msra.mxu1 %v5428_v31  ;;  %4722 = vmatprep.mubr.msk.f32.mxu1 %vm5219_vm1, %v5220_v9 }
 0x78f   : > { %4969 = vmatprep.subr.bf16.mxu1 %v5218_v8 }
 0x791   : > { %v5162_v59 = vpop.eup %5161 }
 0x792   : > { %v1959_v60 = vsel %vm494_vm4, %v5162_v59, 0.0 }
 0x793   : > { %1960 = vadd.xlane.f32.xlu0 %v1959_v60 }
 0x7c3   : > { %v2187_v61 = vpop.f32.mrb[20].mxu0 }
 0x7c4   : > { %v4750_v62 = vpop.f32.mrb[21].mxu0  ;;  %v2191_v63 = vsel %vm494_vm4, %v2187_v61, -inf }
 0x7c5   : > { %2192 = vmax.xlane.f32.xlu1 %v2191_v63 }
 0x7cb   : > { %v2438_v1 = vpop.f32.mrb[22].mxu0 }
 0x7cc   : > { %v4769_v2 = vpop.f32.mrb[23].mxu0 }
 0x820   : > { %v1961_v4 = vpop.xlane.xlu0 %1960 }
 0x821   : > { %5163 = vrcp.f32 %v1961_v4 }
 0x82b   : > { %v5164_v7 = vpop.eup %5163 }
 0x82c   : > { %v1963_v20 = vmul.f32 %v5164_v7, %v5162_v59 }
 0x852   : > { %v2193_v3 = vpop.xlane.xlu1 %2192 }
 0x853   : > { %v2194_v5 = vsub.f32 %v2187_v61, %v2193_v3 }
 0x855   : > { %v2195_v6 = vmul.f32 1.442695, %v2194_v5 }
 0x857   : > { %5165 = vpow2.f32 %v2195_v6 }
 0x860   : > { %v1797_v10 = vpop.f32.mrb[16].mxu1 }
 0x861   : > { %v5166_v14 = vpop.eup %5165  ;;  %v4719_v17 = vpop.f32.mrb[17].mxu1  ;;  %4723 = vmatmul.mubr.msk.f32.vlgmr.msra.gmra.mrb[14].mxu1 %vm414_vm2, %v1797_v10 }
 0x862   : > { %4971 = vmatpush3.bf16.msra.mxu1 %v5464_v15  ;;  %v2197_v19 = vsel %vm494_vm4, %v5166_v14, 0.0  ;;  %4736 = vmatprep.mubr.msk.f32.mxu1 %vm5219_vm1, %v5220_v9  ;;  %v2442_v15 = vsel %vm494_vm4, %v2438_v1, -inf }
 0x863   : > { %2198 = vadd.xlane.f32.xlu1 %v2197_v19  ;;  %4739 = vmatprep.subr.mxu1 %v5220_v9 }
 0x865   : > { %4737 = vmatmul.mubr.msk.f32.vlgmr.msra.gmra.mrb[18].mxu1 %vm494_vm4, %v1963_v20 }
 0x866   : > { %4740 = vmatpush3.msra.mxu1 %v5450_v0  ;;  %4741 = vmatprep.mubr.msk.f32.mxu1 %vm5219_vm1, %v5220_v9 }
 0x867   : > { %4976 = vmatprep.subr.bf16.mxu1 %v5218_v8 }
 0x874   : > { %5108 = vrot.lane.b32.xlu1 %v5358_v49, %s5221_s16 }
 0x898   : > { %2443 = vmax.xlane.f32.xlu1 %v2442_v15 }
 0x8f0   : > { %v2199_v18 = vpop.xlane.xlu1 %2198 }
 0x8f4   : > { %v5109_v11 = vpop.permute.xlu1 %5108 }
 0x8f5   : > { %v5111_v24 = vunpack.i.h.bf16 %v5109_v11  ;;  %v5110_v26 = vunpack.i.l.bf16 %v5109_v11 }
 0x8f7   : > { %v5549_v27 = vpack.c.bf16 %v5111_v24, %v5110_v26 }
 0x8f9   : > { %4989 = vmatpush3.bf16.xpose.msk.msra.mxu0 %vm5310_vm3, %v5549_v27 }
 0x8fa   : > { %4993 = vmatprep.subr.bf16.mxu0 %v5218_v8 }
 0x900   : > { %4787 = vmatmul.mubr.msk.f32.vlgmr.msra.gmra.mrb[24].mxu0 %vm414_vm2, %v5337_v36 }
 0x901   : > { %4805 = vmatprep.mubr.msk.f32.mxu0 %vm5219_vm1, %v5220_v9 }
 0x925   : > { %v2444_v28 = vpop.xlane.xlu1 %2443 }
 0x926   : > { %v2445_v30 = vsub.f32 %v2438_v1, %v2444_v28 }
 0x928   : > { %v2446_v32 = vmul.f32 1.442695, %v2445_v30 }
 0x92a   : > { %5167 = vpow2.f32 %v2446_v32 }
 0x92b   : > { %5169 = vrcp.f32 %v2199_v18 }
 0x934   : > { %v5168_v33 = vpop.eup %5167 }
 0x935   : > { %v2448_v34 = vsel %vm494_vm4, %v5168_v33, 0.0  ;;  %v5170_v35 = vpop.eup %5169 }
 0x936   : > { %2449 = vadd.xlane.f32.xlu0 %v2448_v34  ;;  %v2201_v39 = vmul.f32 %v5170_v35, %v5166_v14 }
 0x938   : > { %v2035_v37 = vpop.f32.mrb[18].mxu1 }
 0x939   : > { %v4738_v38 = vpop.f32.mrb[19].mxu1  ;;  %4742 = vmatmul.mubr.msk.f32.vlgmr.msra.gmra.mrb[14].mxu1 %vm414_vm2, %v2035_v37 }
 0x93a   : > { %4978 = vmatpush3.bf16.msra.mxu1 %v5501_v42  ;;  %4755 = vmatprep.mubr.msk.f32.mxu1 %vm5219_vm1, %v5220_v9 }
 0x93b   : > { %4758 = vmatprep.subr.mxu1 %v5220_v9 }
 0x93d   : > { %4756 = vmatmul.mubr.msk.f32.vlgmr.msra.gmra.mrb[20].mxu1 %vm494_vm4, %v2201_v39 }
 0x93e   : > { %4759 = vmatpush3.msra.mxu1 %v5485_v23  ;;  %4760 = vmatprep.mubr.msk.f32.mxu1 %vm5219_vm1, %v5220_v9 }
 0x93f   : > { %4983 = vmatprep.subr.bf16.mxu1 %v5218_v8 }
 0x94c   : > { %5113 = vrot.lane.b32.xlu0 %v5358_v49, %s5222_s17 }
 0x9c3   : > { %v2450_v21 = vpop.xlane.xlu0 %2449 }
 0x9c4   : > { %5171 = vrcp.f32 %v2450_v21 }
 0x9c7   : > { %v5114_v41 = vpop.permute.xlu0 %5113 }
 0x9c8   : > { %v5116_v42 = vunpack.i.h.bf16 %v5114_v41  ;;  %v5115_v43 = vunpack.i.l.bf16 %v5114_v41 }
 0x9ca   : > { %v5572_v44 = vpack.c.bf16 %v5116_v42, %v5115_v43 }
 0x9cc   : > { %4996 = vmatpush3.bf16.xpose.msk.msra.mxu0 %vm5310_vm3, %v5572_v44 }
 0x9cd   : > { %5000 = vmatprep.subr.bf16.mxu0 %v5218_v8 }
 0x9ce   : > { %v5172_v50 = vpop.eup %5171 }
 0x9cf   : > { %v2452_v56 = vmul.f32 %v5172_v50, %v5168_v33 }
 0x9d3   : > { %v2674_v46 = vpop.f32.mrb[24].mxu0  ;;  %4806 = vmatmul.mubr.msk.f32.vlgmr.msra.gmra.mrb[26].mxu0 %vm414_vm2, %v5376_v12 }
 0x9d4   : > { %v4788_v47 = vpop.f32.mrb[25].mxu0  ;;  %v2678_v48 = vsel %vm494_vm4, %v2674_v46, -inf  ;;  %4824 = vmatprep.mubr.msk.f32.mxu0 %vm5219_vm1, %v5220_v9 }
 0x9d5   : > { %2679 = vmax.xlane.f32.xlu0 %v2678_v48 }
 0xa10   : > { %v2273_v54 = vpop.f32.mrb[20].mxu1 }
 0xa11   : > { %v4757_v55 = vpop.f32.mrb[21].mxu1  ;;  %4761 = vmatmul.mubr.msk.f32.vlgmr.msra.gmra.mrb[14].mxu1 %vm414_vm2, %v2273_v54 }
 0xa12   : > { %4985 = vmatpush3.bf16.msra.mxu1 %v5355_v45  ;;  %4774 = vmatprep.mubr.msk.f32.mxu1 %vm5219_vm1, %v5220_v9 }
 0xa13   : > { %4777 = vmatprep.subr.mxu1 %v5220_v9 }
 0xa15   : > { %4775 = vmatmul.mubr.msk.f32.vlgmr.msra.gmra.mrb[22].mxu1 %vm494_vm4, %v2452_v56 }
 0xa16   : > { %4778 = vmatpush3.msra.mxu1 %v5392_v16  ;;  %4779 = vmatprep.mubr.msk.f32.mxu1 %vm5219_vm1, %v5220_v9 }
 0xa17   : > { %4990 = vmatprep.subr.bf16.mxu1 %v5218_v8 }
 0xa62   : > { %v2680_v57 = vpop.xlane.xlu0 %2679 }
 0xa63   : > { %v2681_v58 = vsub.f32 %v2674_v46, %v2680_v57 }
 0xa65   : > { %v2682_v40 = vmul.f32 1.442695, %v2681_v58 }
 0xa67   : > { %5173 = vpow2.f32 %v2682_v40 }
 0xa71   : > { %v5174_v45 = vpop.eup %5173 }
 0xa72   : > { %v2684_v59 = vsel %vm494_vm4, %v5174_v45, 0.0 }
 0xa73   : > { %2685 = vadd.xlane.f32.xlu1 %v2684_v59 }
 0xa84   : > { %5118 = vrot.lane.b32.xlu1 %v5358_v49, %s5223_s18 }
 0xaa6   : > { %v2912_v60 = vpop.f32.mrb[26].mxu0 }
 0xaa7   : > { %v4807_v61 = vpop.f32.mrb[27].mxu0  ;;  %v2916_v62 = vsel %vm494_vm4, %v2912_v60, -inf }
 0xaa8   : > { %2917 = vmax.xlane.f32.xlu1 %v2916_v62 }
 0xae4   : > { %v5597_v63 = vpop.f32.mrb[14].mxu1 }
 0xae5   : > { %v4762_v1 = vpop.f32.mrb[15].mxu1 }
 0xae8   : > { %v2522_v2 = vpop.f32.mrb[22].mxu1 }
 0xae9   : > { %v4776_v3 = vpop.f32.mrb[23].mxu1  ;;  %4780 = vmatmul.mubr.msk.f32.vlgmr.msra.gmra.mrb[24].mxu1 %vm414_vm2, %v2522_v2 }
 0xaea   : > { %4992 = vmatpush3.bf16.msra.mxu1 %v5549_v27  ;;  %4793 = vmatprep.mubr.msk.f32.mxu1 %vm5219_vm1, %v5220_v9 }
 0xaeb   : > { %4796 = vmatprep.subr.mxu1 %v5220_v9 }
 0xb00   : > { %v2686_v49 = vpop.xlane.xlu1 %2685 }
 0xb01   : > { %5175 = vrcp.f32 %v2686_v49 }
 0xb04   : > { %v5119_v4 = vpop.permute.xlu1 %5118 }
 0xb05   : > { %v5121_v5 = vunpack.i.h.bf16 %v5119_v4  ;;  %v5120_v6 = vunpack.i.l.bf16 %v5119_v4 }
 0xb07   : > { %v5604_v7 = vpack.c.bf16 %v5121_v5, %v5120_v6 }
 0xb09   : > { %5003 = vmatpush3.bf16.xpose.msk.msra.mxu0 %vm5310_vm3, %v5604_v7 }
 0xb0a   : > { %5007 = vmatprep.subr.bf16.mxu0 %v5218_v8 }
 0xb0b   : > { %v5176_v10 = vpop.eup %5175 }
 0xb0c   : > { %v2688_v14 = vmul.f32 %v5176_v10, %v5174_v45 }
 0xb0e   : > { %4794 = vmatmul.mubr.msk.f32.vlgmr.msra.gmra.mrb[26].mxu1 %vm494_vm4, %v2688_v14 }
 0xb0f   : > { %4797 = vmatpush3.msra.mxu1 %v5428_v31  ;;  %4798 = vmatprep.mubr.msk.f32.mxu1 %vm5219_vm1, %v5220_v9 }
 0xb10   : > { %4825 = vmatmul.mubr.msk.f32.vlgmr.msra.gmra.mrb[28].mxu0 %vm414_vm2, %v5402_v22  ;;  %4997 = vmatprep.subr.bf16.mxu1 %v5218_v8 }
 0xb11   : > { %5010 = vmatpush3.bf16.xpose.msk.msra.mxu0 %vm5310_vm3, %v5361_v51  ;;  %4843 = vmatprep.mubr.msk.f32.mxu0 %vm5219_vm1, %v5220_v9 }
 0xb12   : > { %5014 = vmatprep.subr.bf16.mxu0 %v5218_v8 }
 0xb18   : > { %4844 = vmatmul.mubr.msk.f32.vlgmr.msra.gmra.mrb[30].mxu0 %vm414_vm2, %v5320_v29 }
 0xb19   : > { %4862 = vmatprep.mubr.msk.f32.mxu0 %vm5219_vm1, %v5220_v9 }
 0xb35   : > { %v2918_v17 = vpop.xlane.xlu1 %2917 }
 0xb36   : > { %v2919_v19 = vsub.f32 %v2912_v60, %v2918_v17 }
 0xb38   : > { %v2920_v20 = vmul.f32 1.442695, %v2919_v19 }
 0xb3a   : > { %5177 = vpow2.f32 %v2920_v20 }
 0xb44   : > { %v5178_v15 = vpop.eup %5177 }
 0xb45   : > { %v2922_v18 = vsel %vm494_vm4, %v5178_v15, 0.0 }
 0xb46   : > { %2923 = vadd.xlane.f32.xlu0 %v2922_v18 }
 0xbd3   : > { %v2924_v11 = vpop.xlane.xlu0 %2923 }
 0xbd4   : > { %5179 = vrcp.f32 %v2924_v11 }
 0xbde   : > { %v5180_v24 = vpop.eup %5179 }
 0xbdf   : > { %v2926_v28 = vmul.f32 %v5180_v24, %v5178_v15 }
 0xbe1   : > { %v2760_v26 = vpop.f32.mrb[26].mxu1 }
 0xbe2   : > { %v4795_v27 = vpop.f32.mrb[27].mxu1  ;;  %4799 = vmatmul.mubr.msk.f32.vlgmr.msra.gmra.mrb[24].mxu1 %vm414_vm2, %v2760_v26 }
 0xbe3   : > { %4999 = vmatpush3.bf16.msra.mxu1 %v5572_v44  ;;  %v3150_v29 = vpop.f32.mrb[28].mxu0  ;;  %4812 = vmatprep.mubr.msk.f32.mxu1 %vm5219_vm1, %v5220_v9 }
 0xbe4   : > { %v4826_v30 = vpop.f32.mrb[29].mxu0  ;;  %v3154_v32 = vsel %vm494_vm4, %v3150_v29, -inf  ;;  %4815 = vmatprep.subr.mxu1 %v5220_v9 }
 0xbe5   : > { %3155 = vmax.xlane.f32.xlu0 %v3154_v32 }
 0xbe6   : > { %4813 = vmatmul.mubr.msk.f32.vlgmr.msra.gmra.mrb[28].mxu1 %vm494_vm4, %v2926_v28 }
 0xbe7   : > { %4816 = vmatpush3.msra.mxu1 %v5450_v0  ;;  %4817 = vmatprep.mubr.msk.f32.mxu1 %vm5219_vm1, %v5220_v9 }
 0xbe8   : > { %5004 = vmatprep.subr.bf16.mxu1 %v5218_v8 }
 0xbeb   : > { %v3401_v33 = vpop.f32.mrb[30].mxu0 }
 0xbec   : > { %v3405_v34 = vsel %vm494_vm4, %v3401_v33, -inf  ;;  %v4845_v35 = vpop.f32.mrb[31].mxu0 }
 0xbed   : > { %3406 = vmax.xlane.f32.xlu1 %v3405_v34 }
 0xbfe   : > { %5128 = vrot.lane.b32.xlu1 %v5363_v52, %s5222_s17 }
 0xc72   : > { %v3156_v37 = vpop.xlane.xlu0 %3155 }
 0xc73   : > { %v3157_v38 = vsub.f32 %v3150_v29, %v3156_v37 }
 0xc75   : > { %v3158_v39 = vmul.f32 1.442695, %v3157_v38 }
 0xc77   : > { %5181 = vpow2.f32 %v3158_v39 }
 0xc7a   : > { %v3407_v42 = vpop.xlane.xlu1 %3406 }
 0xc7b   : > { %v3408_v43 = vsub.f32 %v3401_v33, %v3407_v42 }
 0xc7d   : > { %v3409_v44 = vmul.f32 1.442695, %v3408_v43 }
 0xc7e   : > { %v5129_v40 = vpop.permute.xlu1 %5128 }
 0xc7f   : > { %5183 = vpow2.f32 %v3409_v44  ;;  %v5131_v59 = vunpack.i.h.bf16 %v5129_v40  ;;  %v5130_v60 = vunpack.i.l.bf16 %v5129_v40 }
 0xc81   : > { %v5182_v21 = vpop.eup %5181  ;;  %v5655_v62 = vpack.c.bf16 %v5131_v59, %v5130_v60 }
 0xc82   : > { %v3160_v41 = vsel %vm494_vm4, %v5182_v21, 0.0 }
 0xc83   : > { %3161 = vadd.xlane.f32.xlu0 %v3160_v41 }
 0xc89   : > { %v5184_v46 = vpop.eup %5183 }
 0xc8a   : > { %v3411_v47 = vsel %vm494_vm4, %v5184_v46, 0.0 }
 0xc99   : > { %5123 = vrot.lane.b32.xlu0 %v5363_v52, %s5221_s16 }
 0xcb8   : > { %3412 = vadd.xlane.f32.xlu0 %v3411_v47  ;;  %v411_v47 = vsub.s32 1, %v5292_v13 }
 0xcb9   : > { %v2998_v48 = vpop.f32.mrb[28].mxu1 }
 0xcba   : > { %v4814_v50 = vpop.f32.mrb[29].mxu1  ;;  %4818 = vmatmul.mubr.msk.f32.vlgmr.msra.gmra.mrb[24].mxu1 %vm414_vm2, %v2998_v48  ;;  %v5717_v48 = vld [vmem:[%s5764_s5] sm:$0xf] }
 0xcbb   : > { %5006 = vmatpush3.bf16.msra.mxu1 %v5604_v7  ;;  %4831 = vmatprep.mubr.msk.f32.mxu1 %vm5219_vm1, %v5220_v9  ;;  %v412_v50 = vrot.slane %v5717_v48, %v411_v47 }
 0xcbc   : > { %4834 = vmatprep.subr.mxu1 %v5220_v9 }
 0xd10   : > { %v3162_v54 = vpop.xlane.xlu0 %3161 }
 0xd11   : > { %5185 = vrcp.f32 %v3162_v54 }
 0xd14   : > { %v5124_v55 = vpop.permute.xlu0 %5123 }
 0xd15   : > { %v5126_v56 = vunpack.i.h.bf16 %v5124_v55  ;;  %v5125_v57 = vunpack.i.l.bf16 %v5124_v55 }
 0xd17   : > { %v5015_v58 = vpack.c.bf16 %v5126_v56, %v5125_v57 }
 0xd19   : > { %5017 = vmatpush3.bf16.xpose.msk.msra.mxu0 %vm5310_vm3, %v5015_v58 }
 0xd1a   : > { %5021 = vmatprep.subr.bf16.mxu0 %v5218_v8 }
 0xd1b   : > { %v5186_v45 = vpop.eup %5185 }
 0xd1c   : > { %v3164_v61 = vmul.f32 %v5186_v45, %v5182_v21 }
 0xd1e   : > { %4832 = vmatmul.mubr.msk.f32.vlgmr.msra.gmra.mrb[30].mxu1 %vm494_vm4, %v3164_v61 }
 0xd1f   : > { %4835 = vmatpush3.msra.mxu1 %v5485_v23  ;;  %4836 = vmatprep.mubr.msk.f32.mxu1 %vm5219_vm1, %v5220_v9 }
 0xd20   : > { %4863 = vmatmul.mubr.msk.f32.vlgmr.msra.gmra.mrb[32].mxu0 %vm414_vm2, %v5337_v36  ;;  %5011 = vmatprep.subr.bf16.mxu1 %v5218_v8 }
 0xd21   : > { %5024 = vmatpush3.bf16.xpose.msk.msra.mxu0 %vm5310_vm3, %v5655_v62  ;;  %4881 = vmatprep.mubr.msk.f32.mxu0 %vm5219_vm1, %v5220_v9 }
 0xd22   : > { %5028 = vmatprep.subr.bf16.mxu0 %v5218_v8 }
 0xd28   : > { %4882 = vmatmul.mubr.msk.f32.vlgmr.msra.gmra.mrb[34].mxu0 %vm414_vm2, %v5376_v12 }
 0xd29   : > { %4900 = vmatprep.mubr.msk.f32.mxu0 %vm5219_vm1, %v5220_v9 }
 0xd45   : > { %v3413_v1 = vpop.xlane.xlu0 %3412 }
 0xd46   : > { %5187 = vrcp.f32 %v3413_v1 }
 0xd50   : > { %v5188_v36 = vpop.eup %5187 }
 0xd51   : > { %v3415_v4 = vmul.f32 %v5188_v36, %v5184_v46 }
 0xdf1   : > { %v3236_v2 = vpop.f32.mrb[30].mxu1 }
 0xdf2   : > { %v4833_v3 = vpop.f32.mrb[31].mxu1  ;;  %4837 = vmatmul.mubr.msk.f32.vlgmr.msra.gmra.mrb[24].mxu1 %vm414_vm2, %v3236_v2 }
 0xdf3   : > { %5013 = vmatpush3.bf16.msra.mxu1 %v5361_v51  ;;  %v3637_v49 = vpop.f32.mrb[32].mxu0  ;;  %4850 = vmatprep.mubr.msk.f32.mxu1 %vm5219_vm1, %v5220_v9 }
 0xdf4   : > { %v4864_v5 = vpop.f32.mrb[33].mxu0  ;;  %v3641_v12 = vsel %vm494_vm4, %v3637_v49, -inf  ;;  %4853 = vmatprep.subr.mxu1 %v5220_v9 }
 0xdf5   : > { %3642 = vmax.xlane.f32.xlu1 %v3641_v12 }
 0xdf6   : > { %4851 = vmatmul.mubr.msk.f32.vlgmr.msra.gmra.mrb[32].mxu1 %vm494_vm4, %v3415_v4 }
 0xdf7   : > { %4854 = vmatpush3.msra.mxu1 %v5392_v16  ;;  %4855 = vmatprep.mubr.msk.f32.mxu1 %vm5219_vm1, %v5220_v9 }
 0xdf8   : > { %5018 = vmatprep.subr.bf16.mxu1 %v5218_v8 }
 0xdfb   : > { %v3875_v51 = vpop.f32.mrb[34].mxu0 }
 0xdfc   : > { %v4883_v6 = vpop.f32.mrb[35].mxu0  ;;  %v3879_v7 = vsel %vm494_vm4, %v3875_v51, -inf }
 0xdfd   : > { %3880 = vmax.xlane.f32.xlu1 %v3879_v7 }
 0xe82   : > { %v3643_v10 = vpop.xlane.xlu1 %3642 }
 0xe83   : > { %v3644_v14 = vsub.f32 %v3637_v49, %v3643_v10 }
 0xe85   : > { %v3645_v17 = vmul.f32 1.442695, %v3644_v14 }
 0xe87   : > { %5189 = vpow2.f32 %v3645_v17 }
 0xe8a   : > { %v3881_v16 = vpop.xlane.xlu1 %3880 }
 0xe8b   : > { %v3882_v15 = vsub.f32 %v3875_v51, %v3881_v16 }
 0xe8d   : > { %v3883_v18 = vmul.f32 1.442695, %v3882_v15 }
 0xe8f   : > { %5191 = vpow2.f32 %v3883_v18 }
 0xe91   : > { %v5190_v19 = vpop.eup %5189 }
 0xe92   : > { %v3647_v20 = vsel %vm494_vm4, %v5190_v19, 0.0 }
 0xe93   : > { %3648 = vadd.xlane.f32.xlu0 %v3647_v20 }
 0xe99   : > { %v5192_v11 = vpop.eup %5191 }
 0xe9a   : > { %v3885_v27 = vsel %vm494_vm4, %v5192_v11, 0.0 }
 0xea9   : > { %5133 = vrot.lane.b32.xlu0 %v5363_v52, %s5223_s18 }
 0xec5   : > { %v3309_v24 = vpop.f32.mrb[24].mxu1 }
 0xec6   : > { %v4838_v26 = vpop.f32.mrb[25].mxu1 }
 0xec8   : > { %3886 = vadd.xlane.f32.xlu0 %v3885_v27 }
 0xec9   : > { %v3485_v29 = vpop.f32.mrb[32].mxu1 }
 0xeca   : > { %v4852_v28 = vpop.f32.mrb[33].mxu1  ;;  %4856 = vmatmul.mubr.msk.f32.vlgmr.msra.gmra.mrb[34].mxu1 %vm414_vm2, %v3485_v29 }
 0xecb   : > { %5020 = vmatpush3.bf16.msra.mxu1 %v5015_v58  ;;  %4869 = vmatprep.mubr.msk.f32.mxu1 %vm5219_vm1, %v5220_v9 }
 0xecc   : > { %4872 = vmatprep.subr.mxu1 %v5220_v9 }
 0xf20   : > { %v3649_v52 = vpop.xlane.xlu0 %3648 }
 0xf21   : > { %5193 = vrcp.f32 %v3649_v52 }
 0xf24   : > { %v5134_v30 = vpop.permute.xlu0 %5133 }
 0xf25   : > { %v5136_v32 = vunpack.i.h.bf16 %v5134_v30  ;;  %v5135_v33 = vunpack.i.l.bf16 %v5134_v30 }
 0xf27   : > { %v5029_v34 = vpack.c.bf16 %v5136_v32, %v5135_v33 }
 0xf29   : > { %5031 = vmatpush3.bf16.xpose.msk.msra.mxu0 %vm5310_vm3, %v5029_v34 }
 0xf2b   : > { %v5194_v35 = vpop.eup %5193 }
 0xf2c   : > { %v3651_v37 = vmul.f32 %v5194_v35, %v5190_v19 }
 0xf2e   : > { %4870 = vmatmul.mubr.msk.f32.vlgmr.msra.gmra.mrb[36].mxu1 %vm494_vm4, %v3651_v37 }
 0xf2f   : > { %4873 = vmatpush3.msra.mxu1 %v5428_v31  ;;  %4874 = vmatprep.mubr.msk.f32.mxu1 %vm5219_vm1, %v5220_v9 }
 0xf30   : > { %4901 = vmatmul.mubr.msk.f32.vlgmr.msra.gmra.mrb[36].mxu0 %vm414_vm2, %v5402_v22  ;;  %5025 = vmatprep.subr.bf16.mxu1 %v5218_v8 }
 0xf55   : > { %v3887_v38 = vpop.xlane.xlu0 %3886 }
 0xf56   : > { %5195 = vrcp.f32 %v3887_v38 }
 0xf60   : > { %v5196_v39 = vpop.eup %5195 }
 0xf61   : > { %v3889_v31 = vmul.f32 %v5196_v39, %v5192_v11  ;;  %v1395_v39 = vsub.s32 2, %v5292_v13 }
0x1001   : > { %v3723_v21 = vpop.f32.mrb[36].mxu1 }
0x1002   : > { %v4871_v25 = vpop.f32.mrb[37].mxu1  ;;  %4875 = vmatmul.mubr.msk.f32.vlgmr.msra.gmra.mrb[34].mxu1 %vm414_vm2, %v3723_v21 }
0x1003   : > { %5027 = vmatpush3.bf16.msra.mxu1 %v5655_v62  ;;  %v4113_v41 = vpop.f32.mrb[36].mxu0  ;;  %4888 = vmatprep.mubr.msk.f32.mxu1 %vm5219_vm1, %v5220_v9  ;;  %v1400_v25 = vsub.s32 3, %v5292_v13 }
0x1004   : > { %v4902_v42 = vpop.f32.mrb[37].mxu0  ;;  %v4117_v43 = vsel %vm494_vm4, %v4113_v41, -inf  ;;  %4891 = vmatprep.subr.mxu1 %v5220_v9 }
0x1005   : > { %4118 = vmax.xlane.f32.xlu1 %v4117_v43 }
0x1006   : > { %4889 = vmatmul.mubr.msk.f32.vlgmr.msra.gmra.mrb[38].mxu1 %vm494_vm4, %v3889_v31  ;;  %v1396_v31 = vrot.slane %v5717_v48, %v1395_v39 }
0x1007   : > { %4892 = vmatpush3.msra.mxu1 %v5450_v0  ;;  %4893 = vmatprep.mubr.msk.f32.mxu1 %vm5219_vm1, %v5220_v9  ;;  %v256_v0 = vld [vmem:[%s5760_s1] sm:$0xff] }
0x1008   : > { %5032 = vmatprep.subr.bf16.mxu1 %v5218_v8  ;;  %v413_v54 = vadd.f32 %v412_v50, %v256_v0 }
0x100a   : > { %v5035_v8 = vadd.f32 %v5521_v53, %v413_v54  ;;  %v5036_v57 = vadd.f32 %v5597_v63, %v413_v54  ;;  %v5037_v40 = vadd.f32 %v3309_v24, %v413_v54 }
0x100c   : > { %v1379_v58 = vsel %vm278_vm0, %v5035_v8, 0.0  ;;  %v2351_v45 = vsel %vm278_vm0, %v5036_v57, 0.0  ;;  %v3314_v59 = vsel %vm278_vm0, %v5037_v40, 0.0 }
0x1092   : > { %v4119_v22 = vpop.xlane.xlu1 %4118 }
0x1093   : > { %v4120_v44 = vsub.f32 %v4113_v41, %v4119_v22  ;;  %v1401_v22 = vrot.slane %v5717_v48, %v1400_v25 }
0x1095   : > { %v4121_v46 = vmul.f32 1.442695, %v4120_v44 }
0x1097   : > { %5197 = vpow2.f32 %v4121_v46 }
0x10a1   : > { %v5198_v55 = vpop.eup %5197 }
0x10a2   : > { %v4123_v56 = vsel %vm494_vm4, %v5198_v55, 0.0 }
0x10a3   : > { %4124 = vadd.xlane.f32.xlu1 %v4123_v56 }
0x10a7   : > { %1380 = vadd.xlane.f32.xlu1 %v1379_v58 }
0x10ab   : > { %2352 = vadd.xlane.f32.xlu1 %v2351_v45 }
0x10af   : > { %3315 = vadd.xlane.f32.xlu1 %v3314_v59 }
0x10d9   : > { %v3961_v60 = vpop.f32.mrb[38].mxu1 }
0x10da   : > { %v4890_v61 = vpop.f32.mrb[39].mxu1  ;;  %4894 = vmatmul.mubr.msk.f32.vlgmr.msra.gmra.mrb[34].mxu1 %vm414_vm2, %v3961_v60 }
0x10db   : > { %5034 = vmatpush3.bf16.msra.mxu1 %v5029_v34  ;;  %4907 = vmatprep.mubr.msk.f32.mxu1 %vm5219_vm1, %v5220_v9 }
0x10dc   : > { %4910 = vmatprep.subr.mxu1 %v5220_v9 }
0x1130   : > { %v4125_v53 = vpop.xlane.xlu1 %4124 }
0x1131   : > { %5199 = vrcp.f32 %v4125_v53 }
0x1134   : > { %v1381_v63 = vpop.xlane.xlu1 %1380 }
0x1135   : > { %v1383_v6 = vmul.f32 0.03125, %v1381_v63 }
0x1137   : > { %v1384_v7 = vsub.f32 %v5035_v8, %v1383_v6 }
0x1138   : > { %v2353_v62 = vpop.xlane.xlu1 %2352 }
0x1139   : > { %v2354_v10 = vmul.f32 0.03125, %v2353_v62  ;;  %v1385_v16 = vmul.f32 %v1384_v7, %v1384_v7 }
0x113b   : > { %v5200_v1 = vpop.eup %5199  ;;  %v2355_v20 = vsub.f32 %v5036_v57, %v2354_v10 }
0x113c   : > { %v4127_v36 = vmul.f32 %v5200_v1, %v5198_v55  ;;  %v3316_v2 = vpop.xlane.xlu1 %3315 }
0x113d   : > { %v3317_v3 = vmul.f32 0.03125, %v3316_v2  ;;  %v2356_v15 = vmul.f32 %v2355_v20, %v2355_v20 }
0x113e   : > { %4908 = vmatmul.mubr.msk.f32.vlgmr.msra.gmra.mrb[40].mxu1 %vm494_vm4, %v4127_v36 }
0x113f   : > { %v3318_v49 = vsub.f32 %v5037_v40, %v3317_v3  ;;  %4911 = vmatpush3.msra.mxu1 %v5485_v23  ;;  %4912 = vmatprep.mubr.msk.f32.mxu1 %vm5219_vm1, %v5220_v9  ;;  %v1386_v9 = vsel %vm278_vm0, %v1385_v16, 0.0  ;;  %v2357_v18 = vsel %vm278_vm0, %v2356_v15, 0.0 }
0x1141   : > { %v3319_v4 = vmul.f32 %v3318_v49, %v3318_v49 }
0x1143   : > { %v3320_v5 = vsel %vm278_vm0, %v3319_v4, 0.0 }
0x1144   : > { %3321 = vadd.xlane.f32.xlu0 %v3320_v5 }
0x11d1   : > { %v3322_v11 = vpop.xlane.xlu0 %3321 }
0x11d2   : > { %v3323_v24 = vmul.f32 0.03125, %v3322_v11 }
0x11d4   : > { %v3324_v28 = vadd.f32 1e-05, %v3323_v24 }
0x11d6   : > { %5201 = vrsqrt.f32 %v3324_v28 }
0x11e0   : > { %v5202_v21 = vpop.eup %5201 }
0x11e1   : > { %v3326_v43 = vmul.f32 %v5202_v21, %v3318_v49 }
0x11e3   : > { %v3327_v0 = vmul.f32 %v3326_v43, %v1396_v31 }
0x11e5   : > { %v3328_v55 = vadd.f32 %v3327_v0, %v1401_v22 }
0x11e7   : > { %4294 = vst.msk [vmem:[%s253_s12 + $0x10] sm:$0xff] %vm278_vm0, %v3328_v55 }
0x1211   : > { %v4199_v12 = vpop.f32.mrb[40].mxu1 }
0x1212   : > { %v4909_v51 = vpop.f32.mrb[41].mxu1  ;;  %4913 = vmatmul.mubr.msk.f32.vlgmr.msra.gmra.mrb[34].mxu1 %vm414_vm2, %v4199_v12 }
0x12e5   : > { %v4272_v14 = vpop.f32.mrb[34].mxu1 }
0x12e6   : > { %v5038_v17 = vadd.f32 %v4272_v14, %v413_v54  ;;  %v4914_v19 = vpop.f32.mrb[35].mxu1 }
0x12e8   : > { %v4277_v23 = vsel %vm278_vm0, %v5038_v17, 0.0 }
0x12e9   : > { %4278 = vadd.xlane.f32.xlu1 %v4277_v23 }
0x12ed   : > { %1387 = vadd.xlane.f32.xlu1 %v1386_v9 }
0x12f1   : > { %2358 = vadd.xlane.f32.xlu1 %v2357_v18 }
0x1376   : > { %v4279_v26 = vpop.xlane.xlu1 %4278 }
0x1377   : > { %v4280_v27 = vmul.f32 0.03125, %v4279_v26 }
0x1379   : > { %v4281_v29 = vsub.f32 %v5038_v17, %v4280_v27 }
0x137a   : > { %v1388_v52 = vpop.xlane.xlu1 %1387 }
0x137b   : > { %v1389_v30 = vmul.f32 0.03125, %v1388_v52  ;;  %v4282_v32 = vmul.f32 %v4281_v29, %v4281_v29 }
0x137d   : > { %v1390_v33 = vadd.f32 1e-05, %v1389_v30  ;;  %v4283_v34 = vsel %vm278_vm0, %v4282_v32, 0.0 }
0x137e   : > { %4284 = vadd.xlane.f32.xlu1 %v4283_v34  ;;  %v2359_v35 = vpop.xlane.xlu1 %2358 }
0x137f   : > { %5203 = vrsqrt.f32 %v1390_v33  ;;  %v2360_v37 = vmul.f32 0.03125, %v2359_v35 }
0x1381   : > { %v2361_v38 = vadd.f32 1e-05, %v2360_v37 }
0x1383   : > { %5205 = vrsqrt.f32 %v2361_v38 }
0x1389   : > { %v5204_v41 = vpop.eup %5203 }
0x138a   : > { %v1392_v42 = vmul.f32 %v5204_v41, %v1384_v7 }
0x138c   : > { %v1397_v44 = vmul.f32 %v1396_v31, %v1392_v42 }
0x138d   : > { %v5206_v46 = vpop.eup %5205 }
0x138e   : > { %v1402_v47 = vadd.f32 %v1401_v22, %v1397_v44  ;;  %v2363_v50 = vmul.f32 %v5206_v46, %v2355_v20 }
0x1390   : > { %4292 = vst.msk [vmem:[%s253_s12] sm:$0xff] %vm278_vm0, %v1402_v47  ;;  %v2364_v13 = vmul.f32 %v2363_v50, %v1396_v31 }
0x1392   : > { %v2365_v54 = vadd.f32 %v2364_v13, %v1401_v22 }
0x1394   : > { %4293 = vst.msk [vmem:[%s253_s12 + $0x8] sm:$0xff] %vm278_vm0, %v2365_v54 }
0x140b   : > { %v4285_v8 = vpop.xlane.xlu1 %4284 }
0x140c   : > { %v4286_v48 = vmul.f32 0.03125, %v4285_v8 }
0x140e   : > { %v4287_v56 = vadd.f32 1e-05, %v4286_v48 }
0x1410   : > { %5207 = vrsqrt.f32 %v4287_v56 }
0x141a   : > { %v5208_v57 = vpop.eup %5207 }
0x141b   : > { %v4289_v58 = vmul.f32 %v5208_v57, %v4281_v29 }
0x141d   : > { %v4290_v40 = vmul.f32 %v4289_v58, %v1396_v31 }
0x141f   : > { %v4291_v45 = vadd.f32 %v4290_v40, %v1401_v22 }
0x1421   : > { %4295 = vst.msk [vmem:[%s253_s12 + $0x18] sm:$0xff] %vm278_vm0, %v4291_v45 }
0x1422 PF: > { %s16_s21 = sadd.s32 1, %s5216_s21  }
0x1423   : > { %p13_p5 = scmp.ge.s32.totalorder %s16_s21, 4  }
0x1425   :  { %15 = sbr.rel (!%p13_p5) target bundleno = 1 (0x1), region = 74 }

</bundles_post_ra>
